<compile_context>
chip_gen: v7x
topology: tpu7x:2x2x1
jax: 0.10.0
libtpu: 0.0.40
codegen_flags: <defaults>
</compile_context>

<pallas_src>
import functools

import jax
import jax.numpy as jnp
from jax import lax
from jax.experimental import pallas as pl
from jax.experimental.pallas import tpu as pltpu

_MIB = 1 << 20


def _round_up(x, m):
    return (x + m - 1) // m * m


# ------------------------- fused 2-layer LSTM kernel ------------------------
def lstm_kernel(x_ref, wih0_ref, whh0_ref, b0_ref, wih1_ref, whh1_ref, b1_ref,
                ys_ref, gx_ref, *, B, T, H, mxu_dtype):
    """Fused 2-layer LSTM over one batch tile, time-major.

    x_ref:  (T*B, 2E) time-major input for this batch tile (B % 8 == 0).
    wih0:   (2E, 4H), whh0: (H, 4H), b0: (1, 4H)    -- layer 0
    wih1:   (H, 4H),  whh1: (H, 4H), b1: (1, 4H)    -- layer 1
    ys_ref: (T*B, H)  layer-1 hidden states (f32).
    gx_ref: (T*B, 4H) VMEM scratch: hoisted layer-0 input projection.
    """
    # Hoist the layer-0 input projection (+bias) out of the recurrence: one
    # big, well-shaped matmul instead of T tiny (B, 2E) ones.  Each step then
    # only has h @ W_hh on the critical path.
    # TODO(synk): for very large T*B, chunk this matmul / store gx in bf16 to
    # stay inside v7x's 64 MiB VMEM.
    gx_ref[...] = (
        jnp.dot(x_ref[...].astype(mxu_dtype), wih0_ref[...],
                preferred_element_type=jnp.float32)
        + b0_ref[...])

    # Hoist the layer-1 bias broadcast (JAX does not CSE broadcast_in_dim).
    b1_b = jnp.broadcast_to(b1_ref[...], (B, 4 * H)).astype(jnp.float32)

    def gate_math(gates, c):
        # PyTorch gate order (i, f, g, o); elementwise math kept in f32 so the
        # sigmoid/tanh go to the EUP and the mul/add to the VPU on every gen.
        # TODO(synk): for production sizes keep H % 128 == 0 so these gate
        # slices are lane-aligned full vregs (here 4H = 128 -> 32-lane extracts).
        i = jax.nn.sigmoid(gates[:, 0 * H:1 * H])
        f = jax.nn.sigmoid(gates[:, 1 * H:2 * H])
        g = jnp.tanh(gates[:, 2 * H:3 * H])
        o = jax.nn.sigmoid(gates[:, 3 * H:4 * H])
        c = f * c + i * g
        h = o * jnp.tanh(c)
        return h, c

    def step(t, carry):
        h0, c0, h1, c1 = carry
        # B is a multiple of 8 -> slice starts are sublane-aligned, so the gx
        # load and the ys store below are full unmasked tiles.
        row = pl.multiple_of(t * B, B)

        # ---- layer 0: precomputed x-proj + recurrent proj ----
        gates0 = (gx_ref[pl.ds(row, B), :]
                  + jnp.dot(h0.astype(mxu_dtype), whh0_ref[...],
                            preferred_element_type=jnp.float32))
        h0, c0 = gate_math(gates0, c0)

        # ---- layer 1: two dots (no per-step concat of [h0, h1]) ----
        # TODO(synk): nn.LSTM dropout(0.5) between layers is train-mode only.
        gates1 = (jnp.dot(h0.astype(mxu_dtype), wih1_ref[...],
                          preferred_element_type=jnp.float32)
                  + jnp.dot(h1.astype(mxu_dtype), whh1_ref[...],
                            preferred_element_type=jnp.float32)
                  + b1_b)
        h1, c1 = gate_math(gates1, c1)

        ys_ref[pl.ds(row, B), :] = h1
        return h0, c0, h1, c1

    zeros = jnp.zeros((B, H), jnp.float32)
    # Fully unroll the short, static recurrence so the LLO scheduler can
    # overlap layer-1 of step t with layer-0 of step t+1 (data-independent).
    # TODO(synk): verify the overlap in a bundle dump; if absent, explicitly
    # skew the two layers across time (software-pipeline the recurrence).
    lax.fori_loop(0, T, step, (zeros, zeros, zeros, zeros), unroll=True)


# ------------------------- vocab projection kernel --------------------------
def proj_kernel(h_ref, w_ref, b_ref, o_ref):
    """(rows, H) @ (H, v_tile) + (1, v_tile) -> (rows, v_tile), lane-dense."""
    o_ref[...] = (jnp.dot(h_ref[...], w_ref[...],
                          preferred_element_type=jnp.float32)
                  + b_ref[...]).astype(o_ref.dtype)


# --------------------------------- wrapper ----------------------------------
def decoder_forward(features, captions, params, *,
                    mxu_dtype=jnp.bfloat16, logits_dtype=jnp.float32,
                    v_tile=512, b_tile=None):
    """features: (B, E) f32, captions: (B, T) int32 -> (B, T, V) logits_dtype."""
    B, T = captions.shape
    E = features.shape[1]
    H = params["whh0"].shape[0]
    V = params["wlin"].shape[1]

    # --- glue in plain JAX: gather, broadcast, concat, pad, layout ----------
    emb = jnp.take(params["embed"], captions, axis=0)                  # (B, T, E)
    feats = jnp.broadcast_to(features[:, None, :], (B, T, E))          # (B, T, E)
    x = jnp.concatenate([feats, emb], axis=2).astype(jnp.float32)      # (B, T, 2E)

    # Pad batch to a sublane multiple so every per-step LSTM load/store is a
    # full, unmasked tile (MXU/VPU cost for 8 rows == 2 rows).
    B_pad = _round_up(B, 8)
    if B_pad != B:
        x = jnp.pad(x, ((0, B_pad - B), (0, 0), (0, 0)))

    if b_tile is None:
        # Two batch tiles when possible: the "parallel" grid axis then shards
        # the recurrence across v7x's 2 TensorCores (no-op on v5e/v6e) and
        # halves the per-program gx scratch.
        b_tile = B_pad // 2 if (B_pad >= 16 and B_pad % 16 == 0) else B_pad
    assert B_pad % b_tile == 0 and b_tile % 8 == 0, (B_pad, b_tile)
    n_bt = B_pad // b_tile

    # Group batch tiles outermost, time-major inside each tile:
    # row = (bt * T + t) * b_tile + j  <->  (t, batch = bt * b_tile + j)
    x_bt = x.reshape(n_bt, b_tile, T, 2 * E).transpose(0, 2, 1, 3)     # (nbt,T,bt,2E)
    x_2d = x_bt.reshape(n_bt * T * b_tile, 2 * E).astype(mxu_dtype)    # (rows, 2E)

    # --- weight prep: bf16 MXU operands on every generation -----------------
    wih0 = params["wih0"].astype(mxu_dtype)
    whh0 = params["whh0"].astype(mxu_dtype)
    wih1 = params["wih1"].astype(mxu_dtype)
    whh1 = params["whh1"].astype(mxu_dtype)
    b0 = params["b0"].astype(jnp.float32)
    b1 = params["b1"].astype(jnp.float32)

    mxu_bytes = jnp.dtype(mxu_dtype).itemsize
    lstm_need = (2 * T * b_tile * 2 * E * mxu_bytes          # x (double-buffered)
                 + 2 * (2 * E + 3 * H) * 4 * H * mxu_bytes   # weights
                 + 2 * 2 * 4 * H * 4                         # biases
                 + 2 * T * b_tile * H * 4                    # ys (double-buffered)
                 + T * b_tile * 4 * H * 4)                   # gx scratch
    lstm_vmem = int(min(max(2 * lstm_need, 32 * _MIB), 64 * _MIB))

    hidden = pl.pallas_call(
        functools.partial(lstm_kernel, B=b_tile, T=T, H=H, mxu_dtype=mxu_dtype),
        out_shape=jax.ShapeDtypeStruct((n_bt * T * b_tile, H), jnp.float32),
        grid=(n_bt,),
        in_specs=[
            pl.BlockSpec((T * b_tile, 2 * E), lambda b: (b, 0)),   # x tile
            pl.BlockSpec((2 * E, 4 * H), lambda b: (0, 0)),        # wih0
            pl.BlockSpec((H, 4 * H), lambda b: (0, 0)),            # whh0
            pl.BlockSpec((1, 4 * H), lambda b: (0, 0)),            # b0
            pl.BlockSpec((H, 4 * H), lambda b: (0, 0)),            # wih1
            pl.BlockSpec((H, 4 * H), lambda b: (0, 0)),            # whh1
            pl.BlockSpec((1, 4 * H), lambda b: (0, 0)),            # b1
        ],
        out_specs=pl.BlockSpec((T * b_tile, H), lambda b: (b, 0)),
        scratch_shapes=[pltpu.VMEM((T * b_tile, 4 * H), jnp.float32)],
        compiler_params=pltpu.CompilerParams(
            dimension_semantics=("parallel",),
            vmem_limit_bytes=lstm_vmem),
    )(x_2d, wih0, whh0, b0, wih1, whh1, b1)                            # (rows, H)

    # --- vocab projection, tiled over V (lane-dense, 128-multiple tiles) ----
    rows = n_bt * T * b_tile
    h_flat = hidden.astype(mxu_dtype)                                  # (rows, H)

    v_tile = min(v_tile, max(128, _round_up(V, 128)))                  # clamp tiny V
    Vp = _round_up(V, v_tile)
    wlin = params["wlin"].astype(mxu_dtype)
    blin = params["blin"].astype(jnp.float32)
    if Vp != V:
        wlin = jnp.pad(wlin, ((0, 0), (0, Vp - V)))
        blin = jnp.pad(blin, ((0, 0), (0, Vp - V)))

    out_bytes = jnp.dtype(logits_dtype).itemsize
    proj_need = (2 * rows * H * mxu_bytes
                 + 2 * H * v_tile * mxu_bytes
                 + 2 * v_tile * 4
                 + 2 * rows * v_tile * out_bytes)
    proj_vmem = int(min(max(2 * proj_need, 32 * _MIB), 64 * _MIB))

    logits = pl.pallas_call(
        proj_kernel,
        out_shape=jax.ShapeDtypeStruct((rows, Vp), logits_dtype),
        grid=(Vp // v_tile,),
        in_specs=[pl.BlockSpec((rows, H), lambda j: (0, 0)),
                  pl.BlockSpec((H, v_tile), lambda j: (0, j)),
                  pl.BlockSpec((1, v_tile), lambda j: (0, j))],
        out_specs=pl.BlockSpec((rows, v_tile), lambda j: (0, j)),
        compiler_params=pltpu.CompilerParams(
            dimension_semantics=("parallel",),
            vmem_limit_bytes=proj_vmem),
    )(h_flat, wlin, blin)                                              # (rows, Vp)

    # Undo the batch-tile layout, drop batch / vocab padding -> (B, T, V).
    logits = logits.reshape(n_bt, T, b_tile, Vp).transpose(0, 2, 1, 3)
    logits = logits.reshape(B_pad, T, Vp)[:B, :, :V]
    return logits


# ---------------- pure-JAX reference (same math, no Pallas) ----------------
def _lstm_layer_ref(x, wih, whh, b, H):
    B = x.shape[0]

    def step(carry, x_t):
        h, c = carry
        gates = x_t @ wih + h @ whh + b
        i, f, g, o = jnp.split(gates, 4, axis=-1)
        i, f, o = jax.nn.sigmoid(i), jax.nn.sigmoid(f), jax.nn.sigmoid(o)
        g = jnp.tanh(g)
        c = f * c + i * g
        h = o * jnp.tanh(c)
        return (h, c), h

    xs = jnp.swapaxes(x, 0, 1)
    (_, _), ys = lax.scan(step, (jnp.zeros((B, H)), jnp.zeros((B, H))), xs)
    return jnp.swapaxes(ys, 0, 1)


def decoder_reference(features, captions, params):
    B, T = captions.shape
    E = features.shape[1]
    H = params["whh0"].shape[0]
    emb = jnp.take(params["embed"], captions, axis=0)
    feats = jnp.broadcast_to(features[:, None, :], (B, T, E))
    x = jnp.concatenate([feats, emb], axis=2)
    y1 = _lstm_layer_ref(x, params["wih0"], params["whh0"], params["b0"], H)
    y2 = _lstm_layer_ref(y1, params["wih1"], params["whh1"], params["b1"], H)
    return y2 @ params["wlin"] + params["blin"]


def init_params(key, embed_size, hidden_size, vocab_size):
    E, H, V = embed_size, hidden_size, vocab_size
    ks = jax.random.split(key, 12)
    k_lstm = 1.0 / jnp.sqrt(H)
    k_lin = 1.0 / jnp.sqrt(H)

    def u(k, shape, scale):
        return jax.random.uniform(k, shape, jnp.float32, -scale, scale)

    return {
        # nn.Embedding default init: N(0, 1)
        "embed": jax.random.normal(ks[0], (V, E), jnp.float32),
        # layer 0 (input size 2E); stored transposed: (in, 4H) / (H, 4H)
        "wih0": u(ks[1], (2 * E, 4 * H), k_lstm),
        "whh0": u(ks[2], (H, 4 * H), k_lstm),
        "b0": u(ks[3], (1, 4 * H), k_lstm) + u(ks[4], (1, 4 * H), k_lstm),  # b_ih + b_hh
        # layer 1 (input size H)
        "wih1": u(ks[5], (H, 4 * H), k_lstm),
        "whh1": u(ks[6], (H, 4 * H), k_lstm),
        "b1": u(ks[7], (1, 4 * H), k_lstm) + u(ks[8], (1, 4 * H), k_lstm),
        # Linear(H, V), stored transposed: (H, V)
        "wlin": u(ks[9], (H, V), k_lin),
        "blin": u(ks[10], (1, V), k_lin),
    }


if __name__ == "__main__":
    B, T, E, H, V = 2, 8, 16, 32, 64

    key = jax.random.PRNGKey(0)
    kp, kf, kc = jax.random.split(key, 3)
    params = init_params(kp, E, H, V)
    features = jax.random.normal(kf, (B, E), jnp.float32)
    captions = jax.random.randint(kc, (B, T), 0, V, jnp.int32)

    ref = jax.block_until_ready(decoder_reference(features, captions, params))

    # f32 MXU path: near-exact check against the reference.
    out = decoder_forward(features, captions, params, mxu_dtype=jnp.float32)
    out = jax.block_until_ready(out)
    assert out.shape == (B, T, V), out.shape
    assert jnp.allclose(out, ref, atol=2e-3, rtol=2e-3), (
        "f32 max abs diff %f" % float(jnp.max(jnp.abs(out - ref))))

    # bf16 MXU path (default, perf-recommended): looser numerical check.
    out_bf = jax.block_until_ready(decoder_forward(features, captions, params))
    assert out_bf.shape == (B, T, V), out_bf.shape
    bf_err = float(jnp.max(jnp.abs(out_bf.astype(jnp.float32) - ref)))
    assert bf_err < 0.15, "bf16 max abs diff %f" % bf_err

    print("KERNEL_OK")
</pallas_src>

<mosaic_0001>
module attributes {stable_mosaic.version = 11 : i64} {
  func.func @lstm_kernel(%arg0: i32, %arg1: memref<64x32xf32, #tpu.memory_space<vmem>>, %arg2: memref<32x128xf32, #tpu.memory_space<vmem>>, %arg3: memref<32x128xf32, #tpu.memory_space<vmem>>, %arg4: memref<1x128xf32, #tpu.memory_space<vmem>>, %arg5: memref<32x128xf32, #tpu.memory_space<vmem>>, %arg6: memref<32x128xf32, #tpu.memory_space<vmem>>, %arg7: memref<1x128xf32, #tpu.memory_space<vmem>>, %arg8: memref<64x32xf32, #tpu.memory_space<vmem>>, %arg9: memref<64x128xf32, #tpu.memory_space<vmem>>) attributes {dimension_semantics = [#tpu.dimension_semantics<parallel>], iteration_bounds = array<i64: 1>, scalar_prefetch = 0 : i64, scratch_operands = 1 : i64, tpu.core_type = #tpu.core_type<tc>, window_params = [{transform_indices = @transform_0, window_bounds = array<i64: 64, 32>}, {pipeline_mode = #tpu.pipeline_mode<synchronous>, transform_indices = @transform_1, window_bounds = array<i64: 32, 128>}, {pipeline_mode = #tpu.pipeline_mode<synchronous>, transform_indices = @transform_2, window_bounds = array<i64: 32, 128>}, {pipeline_mode = #tpu.pipeline_mode<synchronous>, transform_indices = @transform_3, window_bounds = array<i64: 1, 128>}, {pipeline_mode = #tpu.pipeline_mode<synchronous>, transform_indices = @transform_4, window_bounds = array<i64: 32, 128>}, {pipeline_mode = #tpu.pipeline_mode<synchronous>, transform_indices = @transform_5, window_bounds = array<i64: 32, 128>}, {pipeline_mode = #tpu.pipeline_mode<synchronous>, transform_indices = @transform_6, window_bounds = array<i64: 1, 128>}, {transform_indices = @transform_7, window_bounds = array<i64: 64, 32>}]} {
    %c0 = arith.constant 0 : index
    %c0_0 = arith.constant 0 : index
    %0 = vector.load %arg1[%c0, %c0_0] : memref<64x32xf32, #tpu.memory_space<vmem>>, vector<64x32xf32>
    %c0_1 = arith.constant 0 : index
    %c0_2 = arith.constant 0 : index
    %1 = vector.load %arg2[%c0_1, %c0_2] : memref<32x128xf32, #tpu.memory_space<vmem>>, vector<32x128xf32>
    %cst = arith.constant dense<0.000000e+00> : vector<64x128xf32>
    %2 = tpu.matmul %0, %1, %cst {dimension_numbers = #tpu.dot_dimension_numbers<[1], [0], [0], [1], [0, 0, 1, 1], [], []>} : vector<64x32xf32>, vector<32x128xf32>, vector<64x128xf32> -> vector<64x128xf32>
    %c0_3 = arith.constant 0 : index
    %c0_4 = arith.constant 0 : index
    %3 = vector.load %arg4[%c0_3, %c0_4] : memref<1x128xf32, #tpu.memory_space<vmem>>, vector<1x128xf32>
    %4 = vector.broadcast %3 : vector<1x128xf32> to vector<64x128xf32>
    %5 = arith.addf %2, %4 : vector<64x128xf32>
    %c0_5 = arith.constant 0 : index
    %c0_6 = arith.constant 0 : index
    %6 = vector.load %arg9[%c0_5, %c0_6] : memref<64x128xf32, #tpu.memory_space<vmem>>, vector<64x128xf32>
    tpu.vector_store %arg9[%c0_5, %c0_6], %5 {strides = array<i32>} : memref<64x128xf32, #tpu.memory_space<vmem>>, vector<64x128xf32>,
    %c0_7 = arith.constant 0 : index
    %c0_8 = arith.constant 0 : index
    %7 = vector.load %arg7[%c0_7, %c0_8] : memref<1x128xf32, #tpu.memory_space<vmem>>, vector<1x128xf32>
    %8 = vector.shape_cast %7 : vector<1x128xf32> to vector<1x128xf32>
    %9 = vector.broadcast %8 : vector<1x128xf32> to vector<8x128xf32>
    %cst_9 = arith.constant 0.000000e+00 : f32
    %10 = vector.broadcast %cst_9 : f32 to vector<8x32xf32>
    %c0_i32 = arith.constant 0 : i32
    %c8_i32 = arith.constant 8 : i32
    %11 = arith.muli %c0_i32, %c8_i32 : i32
    %12 = tpu.assume_multiple %11, 8 : i32
    %13 = arith.index_cast %12 : i32 to index
    %c0_10 = arith.constant 0 : index
    %14 = vector.load %arg9[%13, %c0_10] : memref<64x128xf32, #tpu.memory_space<vmem>>, vector<8x128xf32>
    %c0_11 = arith.constant 0 : index
    %c0_12 = arith.constant 0 : index
    %15 = vector.load %arg3[%c0_11, %c0_12] : memref<32x128xf32, #tpu.memory_space<vmem>>, vector<32x128xf32>
    %cst_13 = arith.constant dense<0.000000e+00> : vector<8x128xf32>
    %16 = tpu.matmul %10, %15, %cst_13 {dimension_numbers = #tpu.dot_dimension_numbers<[1], [0], [0], [1], [0, 0, 1, 1], [], []>} : vector<8x32xf32>, vector<32x128xf32>, vector<8x128xf32> -> vector<8x128xf32>
    %17 = arith.addf %14, %16 : vector<8x128xf32>
    %18 = vector.extract_strided_slice %17 {offsets = [0, 0], sizes = [8, 32], strides = [1, 1]} : vector<8x128xf32> to vector<8x32xf32>
    %19 = arith.negf %18 : vector<8x32xf32>
    %20 = math.exp %19 : vector<8x32xf32>
    %cst_14 = arith.constant 1.000000e+00 : f32
    %21 = vector.broadcast %cst_14 : f32 to vector<8x32xf32>
    %22 = arith.addf %21, %20 : vector<8x32xf32>
    %23 = arith.divf %21, %22 : vector<8x32xf32>
    %24 = vector.extract_strided_slice %17 {offsets = [0, 32], sizes = [8, 32], strides = [1, 1]} : vector<8x128xf32> to vector<8x32xf32>
    %25 = arith.negf %24 : vector<8x32xf32>
    %26 = math.exp %25 : vector<8x32xf32>
    %cst_15 = arith.constant 1.000000e+00 : f32
    %27 = vector.broadcast %cst_15 : f32 to vector<8x32xf32>
    %28 = arith.addf %27, %26 : vector<8x32xf32>
    %29 = arith.divf %27, %28 : vector<8x32xf32>
    %30 = vector.extract_strided_slice %17 {offsets = [0, 64], sizes = [8, 32], strides = [1, 1]} : vector<8x128xf32> to vector<8x32xf32>
    %31 = math.tanh %30 : vector<8x32xf32>
    %32 = vector.extract_strided_slice %17 {offsets = [0, 96], sizes = [8, 32], strides = [1, 1]} : vector<8x128xf32> to vector<8x32xf32>
    %33 = arith.negf %32 : vector<8x32xf32>
    %34 = math.exp %33 : vector<8x32xf32>
    %cst_16 = arith.constant 1.000000e+00 : f32
    %35 = vector.broadcast %cst_16 : f32 to vector<8x32xf32>
    %36 = arith.addf %35, %34 : vector<8x32xf32>
    %37 = arith.divf %35, %36 : vector<8x32xf32>
    %38 = arith.mulf %29, %10 : vector<8x32xf32>
    %39 = arith.mulf %23, %31 : vector<8x32xf32>
    %40 = arith.addf %38, %39 : vector<8x32xf32>
    %41 = math.tanh %40 : vector<8x32xf32>
    %42 = arith.mulf %37, %41 : vector<8x32xf32>
    %c0_17 = arith.constant 0 : index
    %c0_18 = arith.constant 0 : index
    %43 = vector.load %arg5[%c0_17, %c0_18] : memref<32x128xf32, #tpu.memory_space<vmem>>, vector<32x128xf32>
    %cst_19 = arith.constant dense<0.000000e+00> : vector<8x128xf32>
    %44 = tpu.matmul %42, %43, %cst_19 {dimension_numbers = #tpu.dot_dimension_numbers<[1], [0], [0], [1], [0, 0, 1, 1], [], []>} : vector<8x32xf32>, vector<32x128xf32>, vector<8x128xf32> -> vector<8x128xf32>
    %c0_20 = arith.constant 0 : index
    %c0_21 = arith.constant 0 : index
    %45 = vector.load %arg6[%c0_20, %c0_21] : memref<32x128xf32, #tpu.memory_space<vmem>>, vector<32x128xf32>
    %cst_22 = arith.constant dense<0.000000e+00> : vector<8x128xf32>
    %46 = tpu.matmul %10, %45, %cst_22 {dimension_numbers = #tpu.dot_dimension_numbers<[1], [0], [0], [1], [0, 0, 1, 1], [], []>} : vector<8x32xf32>, vector<32x128xf32>, vector<8x128xf32> -> vector<8x128xf32>
    %47 = arith.addf %44, %46 : vector<8x128xf32>
    %48 = arith.addf %47, %9 : vector<8x128xf32>
    %49 = vector.extract_strided_slice %48 {offsets = [0, 0], sizes = [8, 32], strides = [1, 1]} : vector<8x128xf32> to vector<8x32xf32>
    %50 = arith.negf %49 : vector<8x32xf32>
    %51 = math.exp %50 : vector<8x32xf32>
    %cst_23 = arith.constant 1.000000e+00 : f32
    %52 = vector.broadcast %cst_23 : f32 to vector<8x32xf32>
    %53 = arith.addf %52, %51 : vector<8x32xf32>
    %54 = arith.divf %52, %53 : vector<8x32xf32>
    %55 = vector.extract_strided_slice %48 {offsets = [0, 32], sizes = [8, 32], strides = [1, 1]} : vector<8x128xf32> to vector<8x32xf32>
    %56 = arith.negf %55 : vector<8x32xf32>
    %57 = math.exp %56 : vector<8x32xf32>
    %cst_24 = arith.constant 1.000000e+00 : f32
    %58 = vector.broadcast %cst_24 : f32 to vector<8x32xf32>
    %59 = arith.addf %58, %57 : vector<8x32xf32>
    %60 = arith.divf %58, %59 : vector<8x32xf32>
    %61 = vector.extract_strided_slice %48 {offsets = [0, 64], sizes = [8, 32], strides = [1, 1]} : vector<8x128xf32> to vector<8x32xf32>
    %62 = math.tanh %61 : vector<8x32xf32>
    %63 = vector.extract_strided_slice %48 {offsets = [0, 96], sizes = [8, 32], strides = [1, 1]} : vector<8x128xf32> to vector<8x32xf32>
    %64 = arith.negf %63 : vector<8x32xf32>
    %65 = math.exp %64 : vector<8x32xf32>
    %cst_25 = arith.constant 1.000000e+00 : f32
    %66 = vector.broadcast %cst_25 : f32 to vector<8x32xf32>
    %67 = arith.addf %66, %65 : vector<8x32xf32>
    %68 = arith.divf %66, %67 : vector<8x32xf32>
    %69 = arith.mulf %60, %10 : vector<8x32xf32>
    %70 = arith.mulf %54, %62 : vector<8x32xf32>
    %71 = arith.addf %69, %70 : vector<8x32xf32>
    %72 = math.tanh %71 : vector<8x32xf32>
    %73 = arith.mulf %68, %72 : vector<8x32xf32>
    %74 = arith.index_cast %12 : i32 to index
    %c0_26 = arith.constant 0 : index
    %75 = vector.load %arg8[%74, %c0_26] : memref<64x32xf32, #tpu.memory_space<vmem>>, vector<8x32xf32>
    tpu.vector_store %arg8[%74, %c0_26], %73 {strides = array<i32>} : memref<64x32xf32, #tpu.memory_space<vmem>>, vector<8x32xf32>,
    %c1_i32 = arith.constant 1 : i32
    %c8_i32_27 = arith.constant 8 : i32
    %76 = arith.muli %c1_i32, %c8_i32_27 : i32
    %77 = tpu.assume_multiple %76, 8 : i32
    %78 = arith.index_cast %77 : i32 to index
    %c0_28 = arith.constant 0 : index
    %79 = vector.load %arg9[%78, %c0_28] : memref<64x128xf32, #tpu.memory_space<vmem>>, vector<8x128xf32>
    %c0_29 = arith.constant 0 : index
    %c0_30 = arith.constant 0 : index
    %80 = vector.load %arg3[%c0_29, %c0_30] : memref<32x128xf32, #tpu.memory_space<vmem>>, vector<32x128xf32>
    %cst_31 = arith.constant dense<0.000000e+00> : vector<8x128xf32>
    %81 = tpu.matmul %42, %80, %cst_31 {dimension_numbers = #tpu.dot_dimension_numbers<[1], [0], [0], [1], [0, 0, 1, 1], [], []>} : vector<8x32xf32>, vector<32x128xf32>, vector<8x128xf32> -> vector<8x128xf32>
    %82 = arith.addf %79, %81 : vector<8x128xf32>
    %83 = vector.extract_strided_slice %82 {offsets = [0, 0], sizes = [8, 32], strides = [1, 1]} : vector<8x128xf32> to vector<8x32xf32>
    %84 = arith.negf %83 : vector<8x32xf32>
    %85 = math.exp %84 : vector<8x32xf32>
    %cst_32 = arith.constant 1.000000e+00 : f32
    %86 = vector.broadcast %cst_32 : f32 to vector<8x32xf32>
    %87 = arith.addf %86, %85 : vector<8x32xf32>
    %88 = arith.divf %86, %87 : vector<8x32xf32>
    %89 = vector.extract_strided_slice %82 {offsets = [0, 32], sizes = [8, 32], strides = [1, 1]} : vector<8x128xf32> to vector<8x32xf32>
    %90 = arith.negf %89 : vector<8x32xf32>
    %91 = math.exp %90 : vector<8x32xf32>
    %cst_33 = arith.constant 1.000000e+00 : f32
    %92 = vector.broadcast %cst_33 : f32 to vector<8x32xf32>
    %93 = arith.addf %92, %91 : vector<8x32xf32>
    %94 = arith.divf %92, %93 : vector<8x32xf32>
    %95 = vector.extract_strided_slice %82 {offsets = [0, 64], sizes = [8, 32], strides = [1, 1]} : vector<8x128xf32> to vector<8x32xf32>
    %96 = math.tanh %95 : vector<8x32xf32>
    %97 = vector.extract_strided_slice %82 {offsets = [0, 96], sizes = [8, 32], strides = [1, 1]} : vector<8x128xf32> to vector<8x32xf32>
    %98 = arith.negf %97 : vector<8x32xf32>
    %99 = math.exp %98 : vector<8x32xf32>
    %cst_34 = arith.constant 1.000000e+00 : f32
    %100 = vector.broadcast %cst_34 : f32 to vector<8x32xf32>
    %101 = arith.addf %100, %99 : vector<8x32xf32>
    %102 = arith.divf %100, %101 : vector<8x32xf32>
    %103 = arith.mulf %94, %40 : vector<8x32xf32>
    %104 = arith.mulf %88, %96 : vector<8x32xf32>
    %105 = arith.addf %103, %104 : vector<8x32xf32>
    %106 = math.tanh %105 : vector<8x32xf32>
    %107 = arith.mulf %102, %106 : vector<8x32xf32>
    %c0_35 = arith.constant 0 : index
    %c0_36 = arith.constant 0 : index
    %108 = vector.load %arg5[%c0_35, %c0_36] : memref<32x128xf32, #tpu.memory_space<vmem>>, vector<32x128xf32>
    %cst_37 = arith.constant dense<0.000000e+00> : vector<8x128xf32>
    %109 = tpu.matmul %107, %108, %cst_37 {dimension_numbers = #tpu.dot_dimension_numbers<[1], [0], [0], [1], [0, 0, 1, 1], [], []>} : vector<8x32xf32>, vector<32x128xf32>, vector<8x128xf32> -> vector<8x128xf32>
    %c0_38 = arith.constant 0 : index
    %c0_39 = arith.constant 0 : index
    %110 = vector.load %arg6[%c0_38, %c0_39] : memref<32x128xf32, #tpu.memory_space<vmem>>, vector<32x128xf32>
    %cst_40 = arith.constant dense<0.000000e+00> : vector<8x128xf32>
    %111 = tpu.matmul %73, %110, %cst_40 {dimension_numbers = #tpu.dot_dimension_numbers<[1], [0], [0], [1], [0, 0, 1, 1], [], []>} : vector<8x32xf32>, vector<32x128xf32>, vector<8x128xf32> -> vector<8x128xf32>
    %112 = arith.addf %109, %111 : vector<8x128xf32>
    %113 = arith.addf %112, %9 : vector<8x128xf32>
    %114 = vector.extract_strided_slice %113 {offsets = [0, 0], sizes = [8, 32], strides = [1, 1]} : vector<8x128xf32> to vector<8x32xf32>
    %115 = arith.negf %114 : vector<8x32xf32>
    %116 = math.exp %115 : vector<8x32xf32>
    %cst_41 = arith.constant 1.000000e+00 : f32
    %117 = vector.broadcast %cst_41 : f32 to vector<8x32xf32>
    %118 = arith.addf %117, %116 : vector<8x32xf32>
    %119 = arith.divf %117, %118 : vector<8x32xf32>
    %120 = vector.extract_strided_slice %113 {offsets = [0, 32], sizes = [8, 32], strides = [1, 1]} : vector<8x128xf32> to vector<8x32xf32>
    %121 = arith.negf %120 : vector<8x32xf32>
    %122 = math.exp %121 : vector<8x32xf32>
    %cst_42 = arith.constant 1.000000e+00 : f32
    %123 = vector.broadcast %cst_42 : f32 to vector<8x32xf32>
    %124 = arith.addf %123, %122 : vector<8x32xf32>
    %125 = arith.divf %123, %124 : vector<8x32xf32>
    %126 = vector.extract_strided_slice %113 {offsets = [0, 64], sizes = [8, 32], strides = [1, 1]} : vector<8x128xf32> to vector<8x32xf32>
    %127 = math.tanh %126 : vector<8x32xf32>
    %128 = vector.extract_strided_slice %113 {offsets = [0, 96], sizes = [8, 32], strides = [1, 1]} : vector<8x128xf32> to vector<8x32xf32>
    %129 = arith.negf %128 : vector<8x32xf32>
    %130 = math.exp %129 : vector<8x32xf32>
    %cst_43 = arith.constant 1.000000e+00 : f32
    %131 = vector.broadcast %cst_43 : f32 to vector<8x32xf32>
    %132 = arith.addf %131, %130 : vector<8x32xf32>
    %133 = arith.divf %131, %132 : vector<8x32xf32>
    %134 = arith.mulf %125, %71 : vector<8x32xf32>
    %135 = arith.mulf %119, %127 : vector<8x32xf32>
    %136 = arith.addf %134, %135 : vector<8x32xf32>
    %137 = math.tanh %136 : vector<8x32xf32>
    %138 = arith.mulf %133, %137 : vector<8x32xf32>
    %139 = arith.index_cast %77 : i32 to index
    %c0_44 = arith.constant 0 : index
    %140 = vector.load %arg8[%139, %c0_44] : memref<64x32xf32, #tpu.memory_space<vmem>>, vector<8x32xf32>
    tpu.vector_store %arg8[%139, %c0_44], %138 {strides = array<i32>} : memref<64x32xf32, #tpu.memory_space<vmem>>, vector<8x32xf32>,
    %c2_i32 = arith.constant 2 : i32
    %c8_i32_45 = arith.constant 8 : i32
    %141 = arith.muli %c2_i32, %c8_i32_45 : i32
    %142 = tpu.assume_multiple %141, 8 : i32
    %143 = arith.index_cast %142 : i32 to index
    %c0_46 = arith.constant 0 : index
    %144 = vector.load %arg9[%143, %c0_46] : memref<64x128xf32, #tpu.memory_space<vmem>>, vector<8x128xf32>
    %c0_47 = arith.constant 0 : index
    %c0_48 = arith.constant 0 : index
    %145 = vector.load %arg3[%c0_47, %c0_48] : memref<32x128xf32, #tpu.memory_space<vmem>>, vector<32x128xf32>
    %cst_49 = arith.constant dense<0.000000e+00> : vector<8x128xf32>
    %146 = tpu.matmul %107, %145, %cst_49 {dimension_numbers = #tpu.dot_dimension_numbers<[1], [0], [0], [1], [0, 0, 1, 1], [], []>} : vector<8x32xf32>, vector<32x128xf32>, vector<8x128xf32> -> vector<8x128xf32>
    %147 = arith.addf %144, %146 : vector<8x128xf32>
    %148 = vector.extract_strided_slice %147 {offsets = [0, 0], sizes = [8, 32], strides = [1, 1]} : vector<8x128xf32> to vector<8x32xf32>
    %149 = arith.negf %148 : vector<8x32xf32>
    %150 = math.exp %149 : vector<8x32xf32>
    %cst_50 = arith.constant 1.000000e+00 : f32
    %151 = vector.broadcast %cst_50 : f32 to vector<8x32xf32>
    %152 = arith.addf %151, %150 : vector<8x32xf32>
    %153 = arith.divf %151, %152 : vector<8x32xf32>
    %154 = vector.extract_strided_slice %147 {offsets = [0, 32], sizes = [8, 32], strides = [1, 1]} : vector<8x128xf32> to vector<8x32xf32>
    %155 = arith.negf %154 : vector<8x32xf32>
    %156 = math.exp %155 : vector<8x32xf32>
    %cst_51 = arith.constant 1.000000e+00 : f32
    %157 = vector.broadcast %cst_51 : f32 to vector<8x32xf32>
    %158 = arith.addf %157, %156 : vector<8x32xf32>
    %159 = arith.divf %157, %158 : vector<8x32xf32>
    %160 = vector.extract_strided_slice %147 {offsets = [0, 64], sizes = [8, 32], strides = [1, 1]} : vector<8x128xf32> to vector<8x32xf32>
    %161 = math.tanh %160 : vector<8x32xf32>
    %162 = vector.extract_strided_slice %147 {offsets = [0, 96], sizes = [8, 32], strides = [1, 1]} : vector<8x128xf32> to vector<8x32xf32>
    %163 = arith.negf %162 : vector<8x32xf32>
    %164 = math.exp %163 : vector<8x32xf32>
    %cst_52 = arith.constant 1.000000e+00 : f32
    %165 = vector.broadcast %cst_52 : f32 to vector<8x32xf32>
    %166 = arith.addf %165, %164 : vector<8x32xf32>
    %167 = arith.divf %165, %166 : vector<8x32xf32>
    %168 = arith.mulf %159, %105 : vector<8x32xf32>
    %169 = arith.mulf %153, %161 : vector<8x32xf32>
    %170 = arith.addf %168, %169 : vector<8x32xf32>
    %171 = math.tanh %170 : vector<8x32xf32>
    %172 = arith.mulf %167, %171 : vector<8x32xf32>
    %c0_53 = arith.constant 0 : index
    %c0_54 = arith.constant 0 : index
    %173 = vector.load %arg5[%c0_53, %c0_54] : memref<32x128xf32, #tpu.memory_space<vmem>>, vector<32x128xf32>
    %cst_55 = arith.constant dense<0.000000e+00> : vector<8x128xf32>
    %174 = tpu.matmul %172, %173, %cst_55 {dimension_numbers = #tpu.dot_dimension_numbers<[1], [0], [0], [1], [0, 0, 1, 1], [], []>} : vector<8x32xf32>, vector<32x128xf32>, vector<8x128xf32> -> vector<8x128xf32>
    %c0_56 = arith.constant 0 : index
    %c0_57 = arith.constant 0 : index
    %175 = vector.load %arg6[%c0_56, %c0_57] : memref<32x128xf32, #tpu.memory_space<vmem>>, vector<32x128xf32>
    %cst_58 = arith.constant dense<0.000000e+00> : vector<8x128xf32>
    %176 = tpu.matmul %138, %175, %cst_58 {dimension_numbers = #tpu.dot_dimension_numbers<[1], [0], [0], [1], [0, 0, 1, 1], [], []>} : vector<8x32xf32>, vector<32x128xf32>, vector<8x128xf32> -> vector<8x128xf32>
    %177 = arith.addf %174, %176 : vector<8x128xf32>
    %178 = arith.addf %177, %9 : vector<8x128xf32>
    %179 = vector.extract_strided_slice %178 {offsets = [0, 0], sizes = [8, 32], strides = [1, 1]} : vector<8x128xf32> to vector<8x32xf32>
    %180 = arith.negf %179 : vector<8x32xf32>
    %181 = math.exp %180 : vector<8x32xf32>
    %cst_59 = arith.constant 1.000000e+00 : f32
    %182 = vector.broadcast %cst_59 : f32 to vector<8x32xf32>
    %183 = arith.addf %182, %181 : vector<8x32xf32>
    %184 = arith.divf %182, %183 : vector<8x32xf32>
    %185 = vector.extract_strided_slice %178 {offsets = [0, 32], sizes = [8, 32], strides = [1, 1]} : vector<8x128xf32> to vector<8x32xf32>
    %186 = arith.negf %185 : vector<8x32xf32>
    %187 = math.exp %186 : vector<8x32xf32>
    %cst_60 = arith.constant 1.000000e+00 : f32
    %188 = vector.broadcast %cst_60 : f32 to vector<8x32xf32>
    %189 = arith.addf %188, %187 : vector<8x32xf32>
    %190 = arith.divf %188, %189 : vector<8x32xf32>
    %191 = vector.extract_strided_slice %178 {offsets = [0, 64], sizes = [8, 32], strides = [1, 1]} : vector<8x128xf32> to vector<8x32xf32>
    %192 = math.tanh %191 : vector<8x32xf32>
    %193 = vector.extract_strided_slice %178 {offsets = [0, 96], sizes = [8, 32], strides = [1, 1]} : vector<8x128xf32> to vector<8x32xf32>
    %194 = arith.negf %193 : vector<8x32xf32>
    %195 = math.exp %194 : vector<8x32xf32>
    %cst_61 = arith.constant 1.000000e+00 : f32
    %196 = vector.broadcast %cst_61 : f32 to vector<8x32xf32>
    %197 = arith.addf %196, %195 : vector<8x32xf32>
    %198 = arith.divf %196, %197 : vector<8x32xf32>
    %199 = arith.mulf %190, %136 : vector<8x32xf32>
    %200 = arith.mulf %184, %192 : vector<8x32xf32>
    %201 = arith.addf %199, %200 : vector<8x32xf32>
    %202 = math.tanh %201 : vector<8x32xf32>
    %203 = arith.mulf %198, %202 : vector<8x32xf32>
    %204 = arith.index_cast %142 : i32 to index
    %c0_62 = arith.constant 0 : index
    %205 = vector.load %arg8[%204, %c0_62] : memref<64x32xf32, #tpu.memory_space<vmem>>, vector<8x32xf32>
    tpu.vector_store %arg8[%204, %c0_62], %203 {strides = array<i32>} : memref<64x32xf32, #tpu.memory_space<vmem>>, vector<8x32xf32>,
    %c3_i32 = arith.constant 3 : i32
    %c8_i32_63 = arith.constant 8 : i32
    %206 = arith.muli %c3_i32, %c8_i32_63 : i32
    %207 = tpu.assume_multiple %206, 8 : i32
    %208 = arith.index_cast %207 : i32 to index
    %c0_64 = arith.constant 0 : index
    %209 = vector.load %arg9[%208, %c0_64] : memref<64x128xf32, #tpu.memory_space<vmem>>, vector<8x128xf32>
    %c0_65 = arith.constant 0 : index
    %c0_66 = arith.constant 0 : index
    %210 = vector.load %arg3[%c0_65, %c0_66] : memref<32x128xf32, #tpu.memory_space<vmem>>, vector<32x128xf32>
    %cst_67 = arith.constant dense<0.000000e+00> : vector<8x128xf32>
    %211 = tpu.matmul %172, %210, %cst_67 {dimension_numbers = #tpu.dot_dimension_numbers<[1], [0], [0], [1], [0, 0, 1, 1], [], []>} : vector<8x32xf32>, vector<32x128xf32>, vector<8x128xf32> -> vector<8x128xf32>
    %212 = arith.addf %209, %211 : vector<8x128xf32>
    %213 = vector.extract_strided_slice %212 {offsets = [0, 0], sizes = [8, 32], strides = [1, 1]} : vector<8x128xf32> to vector<8x32xf32>
    %214 = arith.negf %213 : vector<8x32xf32>
    %215 = math.exp %214 : vector<8x32xf32>
    %cst_68 = arith.constant 1.000000e+00 : f32
    %216 = vector.broadcast %cst_68 : f32 to vector<8x32xf32>
    %217 = arith.addf %216, %215 : vector<8x32xf32>
    %218 = arith.divf %216, %217 : vector<8x32xf32>
    %219 = vector.extract_strided_slice %212 {offsets = [0, 32], sizes = [8, 32], strides = [1, 1]} : vector<8x128xf32> to vector<8x32xf32>
    %220 = arith.negf %219 : vector<8x32xf32>
    %221 = math.exp %220 : vector<8x32xf32>
    %cst_69 = arith.constant 1.000000e+00 : f32
    %222 = vector.broadcast %cst_69 : f32 to vector<8x32xf32>
    %223 = arith.addf %222, %221 : vector<8x32xf32>
    %224 = arith.divf %222, %223 : vector<8x32xf32>
    %225 = vector.extract_strided_slice %212 {offsets = [0, 64], sizes = [8, 32], strides = [1, 1]} : vector<8x128xf32> to vector<8x32xf32>
    %226 = math.tanh %225 : vector<8x32xf32>
    %227 = vector.extract_strided_slice %212 {offsets = [0, 96], sizes = [8, 32], strides = [1, 1]} : vector<8x128xf32> to vector<8x32xf32>
    %228 = arith.negf %227 : vector<8x32xf32>
    %229 = math.exp %228 : vector<8x32xf32>
    %cst_70 = arith.constant 1.000000e+00 : f32
    %230 = vector.broadcast %cst_70 : f32 to vector<8x32xf32>
    %231 = arith.addf %230, %229 : vector<8x32xf32>
    %232 = arith.divf %230, %231 : vector<8x32xf32>
    %233 = arith.mulf %224, %170 : vector<8x32xf32>
    %234 = arith.mulf %218, %226 : vector<8x32xf32>
    %235 = arith.addf %233, %234 : vector<8x32xf32>
    %236 = math.tanh %235 : vector<8x32xf32>
    %237 = arith.mulf %232, %236 : vector<8x32xf32>
    %c0_71 = arith.constant 0 : index
    %c0_72 = arith.constant 0 : index
    %238 = vector.load %arg5[%c0_71, %c0_72] : memref<32x128xf32, #tpu.memory_space<vmem>>, vector<32x128xf32>
    %cst_73 = arith.constant dense<0.000000e+00> : vector<8x128xf32>
    %239 = tpu.matmul %237, %238, %cst_73 {dimension_numbers = #tpu.dot_dimension_numbers<[1], [0], [0], [1], [0, 0, 1, 1], [], []>} : vector<8x32xf32>, vector<32x128xf32>, vector<8x128xf32> -> vector<8x128xf32>
    %c0_74 = arith.constant 0 : index
    %c0_75 = arith.constant 0 : index
    %240 = vector.load %arg6[%c0_74, %c0_75] : memref<32x128xf32, #tpu.memory_space<vmem>>, vector<32x128xf32>
    %cst_76 = arith.constant dense<0.000000e+00> : vector<8x128xf32>
    %241 = tpu.matmul %203, %240, %cst_76 {dimension_numbers = #tpu.dot_dimension_numbers<[1], [0], [0], [1], [0, 0, 1, 1], [], []>} : vector<8x32xf32>, vector<32x128xf32>, vector<8x128xf32> -> vector<8x128xf32>
    %242 = arith.addf %239, %241 : vector<8x128xf32>
    %243 = arith.addf %242, %9 : vector<8x128xf32>
    %244 = vector.extract_strided_slice %243 {offsets = [0, 0], sizes = [8, 32], strides = [1, 1]} : vector<8x128xf32> to vector<8x32xf32>
    %245 = arith.negf %244 : vector<8x32xf32>
    %246 = math.exp %245 : vector<8x32xf32>
    %cst_77 = arith.constant 1.000000e+00 : f32
    %247 = vector.broadcast %cst_77 : f32 to vector<8x32xf32>
    %248 = arith.addf %247, %246 : vector<8x32xf32>
    %249 = arith.divf %247, %248 : vector<8x32xf32>
    %250 = vector.extract_strided_slice %243 {offsets = [0, 32], sizes = [8, 32], strides = [1, 1]} : vector<8x128xf32> to vector<8x32xf32>
    %251 = arith.negf %250 : vector<8x32xf32>
    %252 = math.exp %251 : vector<8x32xf32>
    %cst_78 = arith.constant 1.000000e+00 : f32
    %253 = vector.broadcast %cst_78 : f32 to vector<8x32xf32>
    %254 = arith.addf %253, %252 : vector<8x32xf32>
    %255 = arith.divf %253, %254 : vector<8x32xf32>
    %256 = vector.extract_strided_slice %243 {offsets = [0, 64], sizes = [8, 32], strides = [1, 1]} : vector<8x128xf32> to vector<8x32xf32>
    %257 = math.tanh %256 : vector<8x32xf32>
    %258 = vector.extract_strided_slice %243 {offsets = [0, 96], sizes = [8, 32], strides = [1, 1]} : vector<8x128xf32> to vector<8x32xf32>
    %259 = arith.negf %258 : vector<8x32xf32>
    %260 = math.exp %259 : vector<8x32xf32>
    %cst_79 = arith.constant 1.000000e+00 : f32
    %261 = vector.broadcast %cst_79 : f32 to vector<8x32xf32>
    %262 = arith.addf %261, %260 : vector<8x32xf32>
    %263 = arith.divf %261, %262 : vector<8x32xf32>
    %264 = arith.mulf %255, %201 : vector<8x32xf32>
    %265 = arith.mulf %249, %257 : vector<8x32xf32>
    %266 = arith.addf %264, %265 : vector<8x32xf32>
    %267 = math.tanh %266 : vector<8x32xf32>
    %268 = arith.mulf %263, %267 : vector<8x32xf32>
    %269 = arith.index_cast %207 : i32 to index
    %c0_80 = arith.constant 0 : index
    %270 = vector.load %arg8[%269, %c0_80] : memref<64x32xf32, #tpu.memory_space<vmem>>, vector<8x32xf32>
    tpu.vector_store %arg8[%269, %c0_80], %268 {strides = array<i32>} : memref<64x32xf32, #tpu.memory_space<vmem>>, vector<8x32xf32>,
    %c4_i32 = arith.constant 4 : i32
    %c8_i32_81 = arith.constant 8 : i32
    %271 = arith.muli %c4_i32, %c8_i32_81 : i32
    %272 = tpu.assume_multiple %271, 8 : i32
    %273 = arith.index_cast %272 : i32 to index
    %c0_82 = arith.constant 0 : index
    %274 = vector.load %arg9[%273, %c0_82] : memref<64x128xf32, #tpu.memory_space<vmem>>, vector<8x128xf32>
    %c0_83 = arith.constant 0 : index
    %c0_84 = arith.constant 0 : index
    %275 = vector.load %arg3[%c0_83, %c0_84] : memref<32x128xf32, #tpu.memory_space<vmem>>, vector<32x128xf32>
    %cst_85 = arith.constant dense<0.000000e+00> : vector<8x128xf32>
    %276 = tpu.matmul %237, %275, %cst_85 {dimension_numbers = #tpu.dot_dimension_numbers<[1], [0], [0], [1], [0, 0, 1, 1], [], []>} : vector<8x32xf32>, vector<32x128xf32>, vector<8x128xf32> -> vector<8x128xf32>
    %277 = arith.addf %274, %276 : vector<8x128xf32>
    %278 = vector.extract_strided_slice %277 {offsets = [0, 0], sizes = [8, 32], strides = [1, 1]} : vector<8x128xf32> to vector<8x32xf32>
    %279 = arith.negf %278 : vector<8x32xf32>
    %280 = math.exp %279 : vector<8x32xf32>
    %cst_86 = arith.constant 1.000000e+00 : f32
    %281 = vector.broadcast %cst_86 : f32 to vector<8x32xf32>
    %282 = arith.addf %281, %280 : vector<8x32xf32>
    %283 = arith.divf %281, %282 : vector<8x32xf32>
    %284 = vector.extract_strided_slice %277 {offsets = [0, 32], sizes = [8, 32], strides = [1, 1]} : vector<8x128xf32> to vector<8x32xf32>
    %285 = arith.negf %284 : vector<8x32xf32>
    %286 = math.exp %285 : vector<8x32xf32>
    %cst_87 = arith.constant 1.000000e+00 : f32
    %287 = vector.broadcast %cst_87 : f32 to vector<8x32xf32>
    %288 = arith.addf %287, %286 : vector<8x32xf32>
    %289 = arith.divf %287, %288 : vector<8x32xf32>
    %290 = vector.extract_strided_slice %277 {offsets = [0, 64], sizes = [8, 32], strides = [1, 1]} : vector<8x128xf32> to vector<8x32xf32>
    %291 = math.tanh %290 : vector<8x32xf32>
    %292 = vector.extract_strided_slice %277 {offsets = [0, 96], sizes = [8, 32], strides = [1, 1]} : vector<8x128xf32> to vector<8x32xf32>
    %293 = arith.negf %292 : vector<8x32xf32>
    %294 = math.exp %293 : vector<8x32xf32>
    %cst_88 = arith.constant 1.000000e+00 : f32
    %295 = vector.broadcast %cst_88 : f32 to vector<8x32xf32>
    %296 = arith.addf %295, %294 : vector<8x32xf32>
    %297 = arith.divf %295, %296 : vector<8x32xf32>
    %298 = arith.mulf %289, %235 : vector<8x32xf32>
    %299 = arith.mulf %283, %291 : vector<8x32xf32>
    %300 = arith.addf %298, %299 : vector<8x32xf32>
    %301 = math.tanh %300 : vector<8x32xf32>
    %302 = arith.mulf %297, %301 : vector<8x32xf32>
    %c0_89 = arith.constant 0 : index
    %c0_90 = arith.constant 0 : index
    %303 = vector.load %arg5[%c0_89, %c0_90] : memref<32x128xf32, #tpu.memory_space<vmem>>, vector<32x128xf32>
    %cst_91 = arith.constant dense<0.000000e+00> : vector<8x128xf32>
    %304 = tpu.matmul %302, %303, %cst_91 {dimension_numbers = #tpu.dot_dimension_numbers<[1], [0], [0], [1], [0, 0, 1, 1], [], []>} : vector<8x32xf32>, vector<32x128xf32>, vector<8x128xf32> -> vector<8x128xf32>
    %c0_92 = arith.constant 0 : index
    %c0_93 = arith.constant 0 : index
    %305 = vector.load %arg6[%c0_92, %c0_93] : memref<32x128xf32, #tpu.memory_space<vmem>>, vector<32x128xf32>
    %cst_94 = arith.constant dense<0.000000e+00> : vector<8x128xf32>
    %306 = tpu.matmul %268, %305, %cst_94 {dimension_numbers = #tpu.dot_dimension_numbers<[1], [0], [0], [1], [0, 0, 1, 1], [], []>} : vector<8x32xf32>, vector<32x128xf32>, vector<8x128xf32> -> vector<8x128xf32>
    %307 = arith.addf %304, %306 : vector<8x128xf32>
    %308 = arith.addf %307, %9 : vector<8x128xf32>
    %309 = vector.extract_strided_slice %308 {offsets = [0, 0], sizes = [8, 32], strides = [1, 1]} : vector<8x128xf32> to vector<8x32xf32>
    %310 = arith.negf %309 : vector<8x32xf32>
    %311 = math.exp %310 : vector<8x32xf32>
    %cst_95 = arith.constant 1.000000e+00 : f32
    %312 = vector.broadcast %cst_95 : f32 to vector<8x32xf32>
    %313 = arith.addf %312, %311 : vector<8x32xf32>
    %314 = arith.divf %312, %313 : vector<8x32xf32>
    %315 = vector.extract_strided_slice %308 {offsets = [0, 32], sizes = [8, 32], strides = [1, 1]} : vector<8x128xf32> to vector<8x32xf32>
    %316 = arith.negf %315 : vector<8x32xf32>
    %317 = math.exp %316 : vector<8x32xf32>
    %cst_96 = arith.constant 1.000000e+00 : f32
    %318 = vector.broadcast %cst_96 : f32 to vector<8x32xf32>
    %319 = arith.addf %318, %317 : vector<8x32xf32>
    %320 = arith.divf %318, %319 : vector<8x32xf32>
    %321 = vector.extract_strided_slice %308 {offsets = [0, 64], sizes = [8, 32], strides = [1, 1]} : vector<8x128xf32> to vector<8x32xf32>
    %322 = math.tanh %321 : vector<8x32xf32>
    %323 = vector.extract_strided_slice %308 {offsets = [0, 96], sizes = [8, 32], strides = [1, 1]} : vector<8x128xf32> to vector<8x32xf32>
    %324 = arith.negf %323 : vector<8x32xf32>
    %325 = math.exp %324 : vector<8x32xf32>
    %cst_97 = arith.constant 1.000000e+00 : f32
    %326 = vector.broadcast %cst_97 : f32 to vector<8x32xf32>
    %327 = arith.addf %326, %325 : vector<8x32xf32>
    %328 = arith.divf %326, %327 : vector<8x32xf32>
    %329 = arith.mulf %320, %266 : vector<8x32xf32>
    %330 = arith.mulf %314, %322 : vector<8x32xf32>
    %331 = arith.addf %329, %330 : vector<8x32xf32>
    %332 = math.tanh %331 : vector<8x32xf32>
    %333 = arith.mulf %328, %332 : vector<8x32xf32>
    %334 = arith.index_cast %272 : i32 to index
    %c0_98 = arith.constant 0 : index
    %335 = vector.load %arg8[%334, %c0_98] : memref<64x32xf32, #tpu.memory_space<vmem>>, vector<8x32xf32>
    tpu.vector_store %arg8[%334, %c0_98], %333 {strides = array<i32>} : memref<64x32xf32, #tpu.memory_space<vmem>>, vector<8x32xf32>,
    %c5_i32 = arith.constant 5 : i32
    %c8_i32_99 = arith.constant 8 : i32
    %336 = arith.muli %c5_i32, %c8_i32_99 : i32
    %337 = tpu.assume_multiple %336, 8 : i32
    %338 = arith.index_cast %337 : i32 to index
    %c0_100 = arith.constant 0 : index
    %339 = vector.load %arg9[%338, %c0_100] : memref<64x128xf32, #tpu.memory_space<vmem>>, vector<8x128xf32>
    %c0_101 = arith.constant 0 : index
    %c0_102 = arith.constant 0 : index
    %340 = vector.load %arg3[%c0_101, %c0_102] : memref<32x128xf32, #tpu.memory_space<vmem>>, vector<32x128xf32>
    %cst_103 = arith.constant dense<0.000000e+00> : vector<8x128xf32>
    %341 = tpu.matmul %302, %340, %cst_103 {dimension_numbers = #tpu.dot_dimension_numbers<[1], [0], [0], [1], [0, 0, 1, 1], [], []>} : vector<8x32xf32>, vector<32x128xf32>, vector<8x128xf32> -> vector<8x128xf32>
    %342 = arith.addf %339, %341 : vector<8x128xf32>
    %343 = vector.extract_strided_slice %342 {offsets = [0, 0], sizes = [8, 32], strides = [1, 1]} : vector<8x128xf32> to vector<8x32xf32>
    %344 = arith.negf %343 : vector<8x32xf32>
    %345 = math.exp %344 : vector<8x32xf32>
    %cst_104 = arith.constant 1.000000e+00 : f32
    %346 = vector.broadcast %cst_104 : f32 to vector<8x32xf32>
    %347 = arith.addf %346, %345 : vector<8x32xf32>
    %348 = arith.divf %346, %347 : vector<8x32xf32>
    %349 = vector.extract_strided_slice %342 {offsets = [0, 32], sizes = [8, 32], strides = [1, 1]} : vector<8x128xf32> to vector<8x32xf32>
    %350 = arith.negf %349 : vector<8x32xf32>
    %351 = math.exp %350 : vector<8x32xf32>
    %cst_105 = arith.constant 1.000000e+00 : f32
    %352 = vector.broadcast %cst_105 : f32 to vector<8x32xf32>
    %353 = arith.addf %352, %351 : vector<8x32xf32>
    %354 = arith.divf %352, %353 : vector<8x32xf32>
    %355 = vector.extract_strided_slice %342 {offsets = [0, 64], sizes = [8, 32], strides = [1, 1]} : vector<8x128xf32> to vector<8x32xf32>
    %356 = math.tanh %355 : vector<8x32xf32>
    %357 = vector.extract_strided_slice %342 {offsets = [0, 96], sizes = [8, 32], strides = [1, 1]} : vector<8x128xf32> to vector<8x32xf32>
    %358 = arith.negf %357 : vector<8x32xf32>
    %359 = math.exp %358 : vector<8x32xf32>
    %cst_106 = arith.constant 1.000000e+00 : f32
    %360 = vector.broadcast %cst_106 : f32 to vector<8x32xf32>
    %361 = arith.addf %360, %359 : vector<8x32xf32>
    %362 = arith.divf %360, %361 : vector<8x32xf32>
    %363 = arith.mulf %354, %300 : vector<8x32xf32>
    %364 = arith.mulf %348, %356 : vector<8x32xf32>
    %365 = arith.addf %363, %364 : vector<8x32xf32>
    %366 = math.tanh %365 : vector<8x32xf32>
    %367 = arith.mulf %362, %366 : vector<8x32xf32>
    %c0_107 = arith.constant 0 : index
    %c0_108 = arith.constant 0 : index
    %368 = vector.load %arg5[%c0_107, %c0_108] : memref<32x128xf32, #tpu.memory_space<vmem>>, vector<32x128xf32>
    %cst_109 = arith.constant dense<0.000000e+00> : vector<8x128xf32>
    %369 = tpu.matmul %367, %368, %cst_109 {dimension_numbers = #tpu.dot_dimension_numbers<[1], [0], [0], [1], [0, 0, 1, 1], [], []>} : vector<8x32xf32>, vector<32x128xf32>, vector<8x128xf32> -> vector<8x128xf32>
    %c0_110 = arith.constant 0 : index
    %c0_111 = arith.constant 0 : index
    %370 = vector.load %arg6[%c0_110, %c0_111] : memref<32x128xf32, #tpu.memory_space<vmem>>, vector<32x128xf32>
    %cst_112 = arith.constant dense<0.000000e+00> : vector<8x128xf32>
    %371 = tpu.matmul %333, %370, %cst_112 {dimension_numbers = #tpu.dot_dimension_numbers<[1], [0], [0], [1], [0, 0, 1, 1], [], []>} : vector<8x32xf32>, vector<32x128xf32>, vector<8x128xf32> -> vector<8x128xf32>
    %372 = arith.addf %369, %371 : vector<8x128xf32>
    %373 = arith.addf %372, %9 : vector<8x128xf32>
    %374 = vector.extract_strided_slice %373 {offsets = [0, 0], sizes = [8, 32], strides = [1, 1]} : vector<8x128xf32> to vector<8x32xf32>
    %375 = arith.negf %374 : vector<8x32xf32>
    %376 = math.exp %375 : vector<8x32xf32>
    %cst_113 = arith.constant 1.000000e+00 : f32
    %377 = vector.broadcast %cst_113 : f32 to vector<8x32xf32>
    %378 = arith.addf %377, %376 : vector<8x32xf32>
    %379 = arith.divf %377, %378 : vector<8x32xf32>
    %380 = vector.extract_strided_slice %373 {offsets = [0, 32], sizes = [8, 32], strides = [1, 1]} : vector<8x128xf32> to vector<8x32xf32>
    %381 = arith.negf %380 : vector<8x32xf32>
    %382 = math.exp %381 : vector<8x32xf32>
    %cst_114 = arith.constant 1.000000e+00 : f32
    %383 = vector.broadcast %cst_114 : f32 to vector<8x32xf32>
    %384 = arith.addf %383, %382 : vector<8x32xf32>
    %385 = arith.divf %383, %384 : vector<8x32xf32>
    %386 = vector.extract_strided_slice %373 {offsets = [0, 64], sizes = [8, 32], strides = [1, 1]} : vector<8x128xf32> to vector<8x32xf32>
    %387 = math.tanh %386 : vector<8x32xf32>
    %388 = vector.extract_strided_slice %373 {offsets = [0, 96], sizes = [8, 32], strides = [1, 1]} : vector<8x128xf32> to vector<8x32xf32>
    %389 = arith.negf %388 : vector<8x32xf32>
    %390 = math.exp %389 : vector<8x32xf32>
    %cst_115 = arith.constant 1.000000e+00 : f32
    %391 = vector.broadcast %cst_115 : f32 to vector<8x32xf32>
    %392 = arith.addf %391, %390 : vector<8x32xf32>
    %393 = arith.divf %391, %392 : vector<8x32xf32>
    %394 = arith.mulf %385, %331 : vector<8x32xf32>
    %395 = arith.mulf %379, %387 : vector<8x32xf32>
    %396 = arith.addf %394, %395 : vector<8x32xf32>
    %397 = math.tanh %396 : vector<8x32xf32>
    %398 = arith.mulf %393, %397 : vector<8x32xf32>
    %399 = arith.index_cast %337 : i32 to index
    %c0_116 = arith.constant 0 : index
    %400 = vector.load %arg8[%399, %c0_116] : memref<64x32xf32, #tpu.memory_space<vmem>>, vector<8x32xf32>
    tpu.vector_store %arg8[%399, %c0_116], %398 {strides = array<i32>} : memref<64x32xf32, #tpu.memory_space<vmem>>, vector<8x32xf32>,
    %c6_i32 = arith.constant 6 : i32
    %c8_i32_117 = arith.constant 8 : i32
    %401 = arith.muli %c6_i32, %c8_i32_117 : i32
    %402 = tpu.assume_multiple %401, 8 : i32
    %403 = arith.index_cast %402 : i32 to index
    %c0_118 = arith.constant 0 : index
    %404 = vector.load %arg9[%403, %c0_118] : memref<64x128xf32, #tpu.memory_space<vmem>>, vector<8x128xf32>
    %c0_119 = arith.constant 0 : index
    %c0_120 = arith.constant 0 : index
    %405 = vector.load %arg3[%c0_119, %c0_120] : memref<32x128xf32, #tpu.memory_space<vmem>>, vector<32x128xf32>
    %cst_121 = arith.constant dense<0.000000e+00> : vector<8x128xf32>
    %406 = tpu.matmul %367, %405, %cst_121 {dimension_numbers = #tpu.dot_dimension_numbers<[1], [0], [0], [1], [0, 0, 1, 1], [], []>} : vector<8x32xf32>, vector<32x128xf32>, vector<8x128xf32> -> vector<8x128xf32>
    %407 = arith.addf %404, %406 : vector<8x128xf32>
    %408 = vector.extract_strided_slice %407 {offsets = [0, 0], sizes = [8, 32], strides = [1, 1]} : vector<8x128xf32> to vector<8x32xf32>
    %409 = arith.negf %408 : vector<8x32xf32>
    %410 = math.exp %409 : vector<8x32xf32>
    %cst_122 = arith.constant 1.000000e+00 : f32
    %411 = vector.broadcast %cst_122 : f32 to vector<8x32xf32>
    %412 = arith.addf %411, %410 : vector<8x32xf32>
    %413 = arith.divf %411, %412 : vector<8x32xf32>
    %414 = vector.extract_strided_slice %407 {offsets = [0, 32], sizes = [8, 32], strides = [1, 1]} : vector<8x128xf32> to vector<8x32xf32>
    %415 = arith.negf %414 : vector<8x32xf32>
    %416 = math.exp %415 : vector<8x32xf32>
    %cst_123 = arith.constant 1.000000e+00 : f32
    %417 = vector.broadcast %cst_123 : f32 to vector<8x32xf32>
    %418 = arith.addf %417, %416 : vector<8x32xf32>
    %419 = arith.divf %417, %418 : vector<8x32xf32>
    %420 = vector.extract_strided_slice %407 {offsets = [0, 64], sizes = [8, 32], strides = [1, 1]} : vector<8x128xf32> to vector<8x32xf32>
    %421 = math.tanh %420 : vector<8x32xf32>
    %422 = vector.extract_strided_slice %407 {offsets = [0, 96], sizes = [8, 32], strides = [1, 1]} : vector<8x128xf32> to vector<8x32xf32>
    %423 = arith.negf %422 : vector<8x32xf32>
    %424 = math.exp %423 : vector<8x32xf32>
    %cst_124 = arith.constant 1.000000e+00 : f32
    %425 = vector.broadcast %cst_124 : f32 to vector<8x32xf32>
    %426 = arith.addf %425, %424 : vector<8x32xf32>
    %427 = arith.divf %425, %426 : vector<8x32xf32>
    %428 = arith.mulf %419, %365 : vector<8x32xf32>
    %429 = arith.mulf %413, %421 : vector<8x32xf32>
    %430 = arith.addf %428, %429 : vector<8x32xf32>
    %431 = math.tanh %430 : vector<8x32xf32>
    %432 = arith.mulf %427, %431 : vector<8x32xf32>
    %c0_125 = arith.constant 0 : index
    %c0_126 = arith.constant 0 : index
    %433 = vector.load %arg5[%c0_125, %c0_126] : memref<32x128xf32, #tpu.memory_space<vmem>>, vector<32x128xf32>
    %cst_127 = arith.constant dense<0.000000e+00> : vector<8x128xf32>
    %434 = tpu.matmul %432, %433, %cst_127 {dimension_numbers = #tpu.dot_dimension_numbers<[1], [0], [0], [1], [0, 0, 1, 1], [], []>} : vector<8x32xf32>, vector<32x128xf32>, vector<8x128xf32> -> vector<8x128xf32>
    %c0_128 = arith.constant 0 : index
    %c0_129 = arith.constant 0 : index
    %435 = vector.load %arg6[%c0_128, %c0_129] : memref<32x128xf32, #tpu.memory_space<vmem>>, vector<32x128xf32>
    %cst_130 = arith.constant dense<0.000000e+00> : vector<8x128xf32>
    %436 = tpu.matmul %398, %435, %cst_130 {dimension_numbers = #tpu.dot_dimension_numbers<[1], [0], [0], [1], [0, 0, 1, 1], [], []>} : vector<8x32xf32>, vector<32x128xf32>, vector<8x128xf32> -> vector<8x128xf32>
    %437 = arith.addf %434, %436 : vector<8x128xf32>
    %438 = arith.addf %437, %9 : vector<8x128xf32>
    %439 = vector.extract_strided_slice %438 {offsets = [0, 0], sizes = [8, 32], strides = [1, 1]} : vector<8x128xf32> to vector<8x32xf32>
    %440 = arith.negf %439 : vector<8x32xf32>
    %441 = math.exp %440 : vector<8x32xf32>
    %cst_131 = arith.constant 1.000000e+00 : f32
    %442 = vector.broadcast %cst_131 : f32 to vector<8x32xf32>
    %443 = arith.addf %442, %441 : vector<8x32xf32>
    %444 = arith.divf %442, %443 : vector<8x32xf32>
    %445 = vector.extract_strided_slice %438 {offsets = [0, 32], sizes = [8, 32], strides = [1, 1]} : vector<8x128xf32> to vector<8x32xf32>
    %446 = arith.negf %445 : vector<8x32xf32>
    %447 = math.exp %446 : vector<8x32xf32>
    %cst_132 = arith.constant 1.000000e+00 : f32
    %448 = vector.broadcast %cst_132 : f32 to vector<8x32xf32>
    %449 = arith.addf %448, %447 : vector<8x32xf32>
    %450 = arith.divf %448, %449 : vector<8x32xf32>
    %451 = vector.extract_strided_slice %438 {offsets = [0, 64], sizes = [8, 32], strides = [1, 1]} : vector<8x128xf32> to vector<8x32xf32>
    %452 = math.tanh %451 : vector<8x32xf32>
    %453 = vector.extract_strided_slice %438 {offsets = [0, 96], sizes = [8, 32], strides = [1, 1]} : vector<8x128xf32> to vector<8x32xf32>
    %454 = arith.negf %453 : vector<8x32xf32>
    %455 = math.exp %454 : vector<8x32xf32>
    %cst_133 = arith.constant 1.000000e+00 : f32
    %456 = vector.broadcast %cst_133 : f32 to vector<8x32xf32>
    %457 = arith.addf %456, %455 : vector<8x32xf32>
    %458 = arith.divf %456, %457 : vector<8x32xf32>
    %459 = arith.mulf %450, %396 : vector<8x32xf32>
    %460 = arith.mulf %444, %452 : vector<8x32xf32>
    %461 = arith.addf %459, %460 : vector<8x32xf32>
    %462 = math.tanh %461 : vector<8x32xf32>
    %463 = arith.mulf %458, %462 : vector<8x32xf32>
    %464 = arith.index_cast %402 : i32 to index
    %c0_134 = arith.constant 0 : index
    %465 = vector.load %arg8[%464, %c0_134] : memref<64x32xf32, #tpu.memory_space<vmem>>, vector<8x32xf32>
    tpu.vector_store %arg8[%464, %c0_134], %463 {strides = array<i32>} : memref<64x32xf32, #tpu.memory_space<vmem>>, vector<8x32xf32>,
    %c7_i32 = arith.constant 7 : i32
    %c8_i32_135 = arith.constant 8 : i32
    %466 = arith.muli %c7_i32, %c8_i32_135 : i32
    %467 = tpu.assume_multiple %466, 8 : i32
    %468 = arith.index_cast %467 : i32 to index
    %c0_136 = arith.constant 0 : index
    %469 = vector.load %arg9[%468, %c0_136] : memref<64x128xf32, #tpu.memory_space<vmem>>, vector<8x128xf32>
    %c0_137 = arith.constant 0 : index
    %c0_138 = arith.constant 0 : index
    %470 = vector.load %arg3[%c0_137, %c0_138] : memref<32x128xf32, #tpu.memory_space<vmem>>, vector<32x128xf32>
    %cst_139 = arith.constant dense<0.000000e+00> : vector<8x128xf32>
    %471 = tpu.matmul %432, %470, %cst_139 {dimension_numbers = #tpu.dot_dimension_numbers<[1], [0], [0], [1], [0, 0, 1, 1], [], []>} : vector<8x32xf32>, vector<32x128xf32>, vector<8x128xf32> -> vector<8x128xf32>
    %472 = arith.addf %469, %471 : vector<8x128xf32>
    %473 = vector.extract_strided_slice %472 {offsets = [0, 0], sizes = [8, 32], strides = [1, 1]} : vector<8x128xf32> to vector<8x32xf32>
    %474 = arith.negf %473 : vector<8x32xf32>
    %475 = math.exp %474 : vector<8x32xf32>
    %cst_140 = arith.constant 1.000000e+00 : f32
    %476 = vector.broadcast %cst_140 : f32 to vector<8x32xf32>
    %477 = arith.addf %476, %475 : vector<8x32xf32>
    %478 = arith.divf %476, %477 : vector<8x32xf32>
    %479 = vector.extract_strided_slice %472 {offsets = [0, 32], sizes = [8, 32], strides = [1, 1]} : vector<8x128xf32> to vector<8x32xf32>
    %480 = arith.negf %479 : vector<8x32xf32>
    %481 = math.exp %480 : vector<8x32xf32>
    %cst_141 = arith.constant 1.000000e+00 : f32
    %482 = vector.broadcast %cst_141 : f32 to vector<8x32xf32>
    %483 = arith.addf %482, %481 : vector<8x32xf32>
    %484 = arith.divf %482, %483 : vector<8x32xf32>
    %485 = vector.extract_strided_slice %472 {offsets = [0, 64], sizes = [8, 32], strides = [1, 1]} : vector<8x128xf32> to vector<8x32xf32>
    %486 = math.tanh %485 : vector<8x32xf32>
    %487 = vector.extract_strided_slice %472 {offsets = [0, 96], sizes = [8, 32], strides = [1, 1]} : vector<8x128xf32> to vector<8x32xf32>
    %488 = arith.negf %487 : vector<8x32xf32>
    %489 = math.exp %488 : vector<8x32xf32>
    %cst_142 = arith.constant 1.000000e+00 : f32
    %490 = vector.broadcast %cst_142 : f32 to vector<8x32xf32>
    %491 = arith.addf %490, %489 : vector<8x32xf32>
    %492 = arith.divf %490, %491 : vector<8x32xf32>
    %493 = arith.mulf %484, %430 : vector<8x32xf32>
    %494 = arith.mulf %478, %486 : vector<8x32xf32>
    %495 = arith.addf %493, %494 : vector<8x32xf32>
    %496 = math.tanh %495 : vector<8x32xf32>
    %497 = arith.mulf %492, %496 : vector<8x32xf32>
    %c0_143 = arith.constant 0 : index
    %c0_144 = arith.constant 0 : index
    %498 = vector.load %arg5[%c0_143, %c0_144] : memref<32x128xf32, #tpu.memory_space<vmem>>, vector<32x128xf32>
    %cst_145 = arith.constant dense<0.000000e+00> : vector<8x128xf32>
    %499 = tpu.matmul %497, %498, %cst_145 {dimension_numbers = #tpu.dot_dimension_numbers<[1], [0], [0], [1], [0, 0, 1, 1], [], []>} : vector<8x32xf32>, vector<32x128xf32>, vector<8x128xf32> -> vector<8x128xf32>
    %c0_146 = arith.constant 0 : index
    %c0_147 = arith.constant 0 : index
    %500 = vector.load %arg6[%c0_146, %c0_147] : memref<32x128xf32, #tpu.memory_space<vmem>>, vector<32x128xf32>
    %cst_148 = arith.constant dense<0.000000e+00> : vector<8x128xf32>
    %501 = tpu.matmul %463, %500, %cst_148 {dimension_numbers = #tpu.dot_dimension_numbers<[1], [0], [0], [1], [0, 0, 1, 1], [], []>} : vector<8x32xf32>, vector<32x128xf32>, vector<8x128xf32> -> vector<8x128xf32>
    %502 = arith.addf %499, %501 : vector<8x128xf32>
    %503 = arith.addf %502, %9 : vector<8x128xf32>
    %504 = vector.extract_strided_slice %503 {offsets = [0, 0], sizes = [8, 32], strides = [1, 1]} : vector<8x128xf32> to vector<8x32xf32>
    %505 = arith.negf %504 : vector<8x32xf32>
    %506 = math.exp %505 : vector<8x32xf32>
    %cst_149 = arith.constant 1.000000e+00 : f32
    %507 = vector.broadcast %cst_149 : f32 to vector<8x32xf32>
    %508 = arith.addf %507, %506 : vector<8x32xf32>
    %509 = arith.divf %507, %508 : vector<8x32xf32>
    %510 = vector.extract_strided_slice %503 {offsets = [0, 32], sizes = [8, 32], strides = [1, 1]} : vector<8x128xf32> to vector<8x32xf32>
    %511 = arith.negf %510 : vector<8x32xf32>
    %512 = math.exp %511 : vector<8x32xf32>
    %cst_150 = arith.constant 1.000000e+00 : f32
    %513 = vector.broadcast %cst_150 : f32 to vector<8x32xf32>
    %514 = arith.addf %513, %512 : vector<8x32xf32>
    %515 = arith.divf %513, %514 : vector<8x32xf32>
    %516 = vector.extract_strided_slice %503 {offsets = [0, 64], sizes = [8, 32], strides = [1, 1]} : vector<8x128xf32> to vector<8x32xf32>
    %517 = math.tanh %516 : vector<8x32xf32>
    %518 = vector.extract_strided_slice %503 {offsets = [0, 96], sizes = [8, 32], strides = [1, 1]} : vector<8x128xf32> to vector<8x32xf32>
    %519 = arith.negf %518 : vector<8x32xf32>
    %520 = math.exp %519 : vector<8x32xf32>
    %cst_151 = arith.constant 1.000000e+00 : f32
    %521 = vector.broadcast %cst_151 : f32 to vector<8x32xf32>
    %522 = arith.addf %521, %520 : vector<8x32xf32>
    %523 = arith.divf %521, %522 : vector<8x32xf32>
    %524 = arith.mulf %515, %461 : vector<8x32xf32>
    %525 = arith.mulf %509, %517 : vector<8x32xf32>
    %526 = arith.addf %524, %525 : vector<8x32xf32>
    %527 = math.tanh %526 : vector<8x32xf32>
    %528 = arith.mulf %523, %527 : vector<8x32xf32>
    %529 = arith.index_cast %467 : i32 to index
    %c0_152 = arith.constant 0 : index
    %530 = vector.load %arg8[%529, %c0_152] : memref<64x32xf32, #tpu.memory_space<vmem>>, vector<8x32xf32>
    tpu.vector_store %arg8[%529, %c0_152], %528 {strides = array<i32>} : memref<64x32xf32, #tpu.memory_space<vmem>>, vector<8x32xf32>,
    %c8_i32_153 = arith.constant 8 : i32
    return
  }
  func.func @transform_0(%arg0: i32) -> (i32, i32) {
    %c0_i32 = arith.constant 0 : i32
    %c0_i32_0 = arith.constant 0 : i32
    return %arg0, %c0_i32 : i32, i32
  }
  func.func @transform_1(%arg0: i32) -> (i32, i32) {
    %c0_i32 = arith.constant 0 : i32
    %c0_i32_0 = arith.constant 0 : i32
    %c0_i32_1 = arith.constant 0 : i32
    return %c0_i32, %c0_i32_0 : i32, i32
  }
  func.func @transform_2(%arg0: i32) -> (i32, i32) {
    %c0_i32 = arith.constant 0 : i32
    %c0_i32_0 = arith.constant 0 : i32
    %c0_i32_1 = arith.constant 0 : i32
    return %c0_i32, %c0_i32_0 : i32, i32
  }
  func.func @transform_3(%arg0: i32) -> (i32, i32) {
    %c0_i32 = arith.constant 0 : i32
    %c0_i32_0 = arith.constant 0 : i32
    %c0_i32_1 = arith.constant 0 : i32
    return %c0_i32, %c0_i32_0 : i32, i32
  }
  func.func @transform_4(%arg0: i32) -> (i32, i32) {
    %c0_i32 = arith.constant 0 : i32
    %c0_i32_0 = arith.constant 0 : i32
    %c0_i32_1 = arith.constant 0 : i32
    return %c0_i32, %c0_i32_0 : i32, i32
  }
  func.func @transform_5(%arg0: i32) -> (i32, i32) {
    %c0_i32 = arith.constant 0 : i32
    %c0_i32_0 = arith.constant 0 : i32
    %c0_i32_1 = arith.constant 0 : i32
    return %c0_i32, %c0_i32_0 : i32, i32
  }
  func.func @transform_6(%arg0: i32) -> (i32, i32) {
    %c0_i32 = arith.constant 0 : i32
    %c0_i32_0 = arith.constant 0 : i32
    %c0_i32_1 = arith.constant 0 : i32
    return %c0_i32, %c0_i32_0 : i32, i32
  }
  func.func @transform_7(%arg0: i32) -> (i32, i32) {
    %c0_i32 = arith.constant 0 : i32
    %c0_i32_0 = arith.constant 0 : i32
    return %arg0, %c0_i32 : i32, i32
  }
}

</mosaic_0001>

<bundles_post_ra>
// kernel: tpu_custom_call.1
= control target key start
LH: loop header
LB: loop body
LE: loop exit
PB: predicated region body
PF: predicated region fallthrough
CT: control target
= control target key end

     0   :  { %12 = vsyncpa [#allocation4], 0  ;;  %s3289_s24 = smov [#allocation3]   ;;  %s3812_s0 = inlined_call_operand.vmem [shape: f32[64,32], index: 0, kind: input, shape index: {}]   ;;  %s3813_s1 = inlined_call_operand.vmem [shape: f32[32,128], index: 1, kind: input, shape index: {}]   ;;  %s3814_s2 = inlined_call_operand.vmem [shape: f32[32,128], index: 2, kind: input, shape index: {}]   ;;  %s3815_s3 = inlined_call_operand.vmem [shape: f32[1,128], index: 3, kind: input, shape index: {}]   ;;  %s3816_s4 = inlined_call_operand.vmem [shape: f32[32,128], index: 4, kind: input, shape index: {}]   ;;  %s3817_s5 = inlined_call_operand.hbm [shape: f32[32,128], index: 5, kind: input, shape index: {}]   ;;  %s3818_s6 = inlined_call_operand.vmem [shape: f32[1,128], index: 6, kind: input, shape index: {}]   ;;  %s3819_s7 = inlined_call_operand.vmem [shape: f32[64,32], index: 7, kind: output, shape index: {}]  }
   0x1   :  { %s28_s25 = sshll.u32 %s3289_s24, 4  ;;  %s3265_s28 = scalar_lea.hbm %s3817_s5, 512  ;;  %s29_s25 = int_to_ptr.vmem [resolvable:$true] %s28_s25 }
   0x2   :  { %p3266_p0 = scmp.ne.s32.totalorder %s3817_s5, %s3265_s28  ;;  %p3269_p1 = scmp.lt.u32.totalorder %s3265_s28, %s3817_s5 }
   0x4   :  { %p3271_p2 = pnand %p3269_p1, %p3266_p0 }
   0x6   :  { %3274 = shalt.err (!%p3271_p2)
}
   0x7   :  { %s3275_s10 = scalar_lea.vmem %s29_s25, 512  ;;  %p3280_p4 = scmp.lt.s32.totalorder %s29_s25, %s29_s25 }
   0x8   :  { %p3276_p3 = scmp.ne.s32.totalorder %s29_s25, %s3275_s10  ;;  %p3281_p5 = scmp.lt.s32.totalorder %s3275_s10, %s3275_s10 }
   0xa   :  { %p3282_p6 = por %p3281_p5, %p3280_p4 }
   0xc   :  { %p3283_p7 = pnand %p3282_p6, %p3276_p3 }
   0xe   :  { %3286 = shalt.err (!%p3283_p7)
}
   0xf   :  { %s3290_s11 = smov 128   ;;  %s3291_s12 = smov 8  }
  0x10   :  { %34 = dma.hbm_to_vmem [thread:$0]  %s3817_s5, 512, %s29_s25, [#allocation4], %s3290_s11, %s3290_s11, %s3291_s12  }
  0x11   :  { %3287 = dma.done.wait [#allocation4], 512  }
  0x12   :  { %3288 = vsyncadd [#allocation4], 4294966784  ;;  %v3292_v0 = vmov 0.0|0.0   ;;  %vm3293_vm0 = vmmov 0   ;;  %v3294_v1 = vmov 0.0   ;;  %v48_v2 = vld [vmem:[%s3813_s1] sm:$0xff] }
  0x13   :  { %2983 = vmatprep.subr.bf16.mxu1 %v3292_v0  ;;  %2719 = vmatprep.mubr.msk.f32.mxu1 %vm3293_vm0, %v3294_v1  ;;  %v49_v3 = vld [vmem:[%s3813_s1 + $0x8] sm:$0xff]  ;;  %v205_v4 = vld [vmem:[%s3814_s2] sm:$0xff]  ;;  %vm59_vm1 = vcmask 261120   ;;  %v50_v7 = vld [vmem:[%s3813_s1 + $0x10] sm:$0xff]  ;;  %s3295_s12 = smov 64   ;;  %s3296_s13 = smov 32  }
  0x14   :  { %v2975_v5 = vpack.c.bf16 %v49_v3, %v48_v2  ;;  %v206_v6 = vld [vmem:[%s3814_s2 + $0x8] sm:$0xff]  ;;  %v51_v8 = vld [vmem:[%s3813_s1 + $0x18] sm:$0xff]  ;;  %v40_v11 = vld [vmem:[%s3812_s0] sm:$0xff] }
  0x15   :  { %v3370_v9 = vpack.c.bf16 %v206_v6, %v205_v4  ;;  %v2979_v10 = vpack.c.bf16 %v51_v8, %v50_v7  ;;  %v207_v12 = vld [vmem:[%s3814_s2 + $0x10] sm:$0xff]  ;;  %v208_v13 = vld [vmem:[%s3814_s2 + $0x18] sm:$0xff]  ;;  %2699 = vmatprep.mubr.msk.f32.mxu0 %vm59_vm1, %v40_v11  ;;  %v41_v15 = vld [vmem:[%s3812_s0 + $0x8] sm:$0xff] }
  0x16   :  { %2976 = vmatprep.subr.bf16.mxu0 %v2975_v5  ;;  %v3383_v14 = vpack.c.bf16 %v208_v13, %v207_v12  ;;  %v3399_v16 = vld [vmem:[%s3815_s3] ss:$0 sm:$0xff]  ;;  %v308_v34 = vld [vmem:[%s3816_s4 + $0x8] sm:$0xff]  ;;  %v42_v38 = vld [vmem:[%s3812_s0 + $0x10] sm:$0xff] }
  0x17   :  { %2978 = vmatpush3.bf16.msra.mxu0 %v2975_v5  ;;  %2985 = vmatpush3.bf16.msra.mxu1 %v3370_v9  ;;  %v307_v33 = vld [vmem:[%s3816_s4] sm:$0xff]  ;;  %v312_v37 = vld [vmem:[#allocation3 + $0x8] sm:$0xff]  ;;  %v43_v39 = vld [vmem:[%s3812_s0 + $0x18] sm:$0xff] }
  0x18   :  { %2980 = vmatprep.subr.bf16.mxu0 %v2979_v10  ;;  %2986 = vmatprep.subr.bf16.mxu1 %v3292_v0  ;;  %v311_v35 = vld [vmem:[#allocation3] sm:$0xff]  ;;  %v3415_v36 = vpack.c.bf16 %v308_v34, %v307_v33  ;;  %v313_v41 = vld [vmem:[#allocation3 + $0x10] sm:$0xff]  ;;  %v314_v42 = vld [vmem:[#allocation3 + $0x18] sm:$0xff] }
  0x19   :  { %v3423_v40 = vpack.c.bf16 %v312_v37, %v311_v35  ;;  %v44_v43 = vld [vmem:[%s3812_s0 + $0x20] sm:$0xff]  ;;  %v309_v44 = vld [vmem:[%s3816_s4 + $0x10] sm:$0xff]  ;;  %v310_v45 = vld [vmem:[%s3816_s4 + $0x18] sm:$0xff]  ;;  %v3438_v46 = vpack.c.bf16 %v314_v42, %v313_v41 }
  0x1a   :  { %v3440_v47 = vpack.c.bf16 %v310_v45, %v309_v44  ;;  %v45_v48 = vld [vmem:[%s3812_s0 + $0x28] sm:$0xff]  ;;  %v46_v49 = vld [vmem:[%s3812_s0 + $0x30] sm:$0xff]  ;;  %v47_v50 = vld [vmem:[%s3812_s0 + $0x38] sm:$0xff] }
  0x1b   :  { %2982 = vmatpush3.bf16.msra.mxu0 %v2979_v10  ;;  %2988 = vmatpush3.bf16.msra.mxu1 %v3383_v14  ;;  %v3503_v2 = vld [vmem:[%s3818_s6] ss:$0 sm:$0xff] }
  0x1c   :  { %2995 = vmatprep.subr.bf16.mxu0 %v3292_v0  ;;  %2989 = vmatprep.subr.bf16.mxu1 %v3292_v0 }
  0x1e   :  { %2700 = vmatmul.mubr.msk.f32.vlgmr.msra.gmra.mrb[0].mxu0 %vm59_vm1, %v41_v15  ;;  %2720 = vmatmul.mubr.f32.vlgmr.msra.gmra.mrb[0].mxu1 %v3294_v1 }
  0x1f   :  { %2730 = vmatprep.mubr.msk.f32.mxu1 %vm3293_vm0, %v3294_v1  ;;  %2702 = vmatprep.mubr.msk.f32.mxu0 %vm59_vm1, %v42_v38 }
  0x20   :  { %2997 = vmatpush3.bf16.msra.mxu0 %v3415_v36  ;;  %2991 = vmatpush3.bf16.msra.mxu1 %v3423_v40 }
  0x21   :  { %2992 = vmatprep.subr.bf16.mxu1 %v3292_v0  ;;  %2998 = vmatprep.subr.bf16.mxu0 %v3292_v0 }
  0x22   :  { %2703 = vmatmul.mubr.msk.f32.gmra.mrb[2].mxu0 %vm59_vm1, %v43_v39 }
  0x23   :  { %2705 = vmatprep.mubr.msk.f32.mxu0 %vm59_vm1, %v44_v43 }
  0x24   :  { %3000 = vmatpush3.bf16.msra.mxu0 %v3440_v47  ;;  %2994 = vmatpush3.bf16.msra.mxu1 %v3438_v46 }
  0x25   :  { %3001 = vmatprep.subr.bf16.mxu1 %v3292_v0  ;;  %3007 = vmatprep.subr.bf16.mxu0 %v3292_v0 }
  0x26   :  { %2706 = vmatmul.mubr.msk.f32.gmra.mrb[4].mxu0 %vm59_vm1, %v45_v48 }
  0x27   :  { %2708 = vmatprep.mubr.msk.f32.mxu0 %vm59_vm1, %v46_v49  ;;  %2731 = vmatmul.mubr.f32.vlgmr.msra.gmra.mrb[2].mxu1 %v3294_v1 }
  0x28   :  { %3003 = vmatpush3.bf16.msra.mxu1 %v3370_v9  ;;  %2752 = vmatprep.mubr.msk.f32.mxu1 %vm3293_vm0, %v3294_v1 }
  0x29   :  { %3004 = vmatprep.subr.bf16.mxu1 %v3292_v0 }
  0x2a   :  { %2709 = vmatmul.mubr.msk.f32.gmra.mrb[6].mxu0 %vm59_vm1, %v47_v50 }
  0x2b   :  { %2741 = vmatprep.mubr.msk.f32.mxu0 %vm3293_vm0, %v3294_v1 }
  0x2c   :  { %3006 = vmatpush3.bf16.msra.mxu1 %v3383_v14 }
  0x2d   :  { %3013 = vmatprep.subr.bf16.mxu1 %v3292_v0 }
  0xf1   :  { %v3401_v17 = vpop.f32.mrb[0].mxu0  ;;  %v278_v18 = vpop.f32.mrb[0].mxu1 }
  0xf2   :  { %v150_v19 = vpop.f32.mrb[1].mxu0  ;;  %v2721_v20 = vpop.f32.mrb[1].mxu1  ;;  %v156_v63 = vadd.f32 %v3401_v17, %v3399_v16 }
  0xf3   :  { %v151_v21 = vadd.f32 %v3399_v16, %v150_v19 }
  0xf5   :  { %v282_v22 = vadd.f32 %v278_v18, %v151_v21  ;;  %v3472_v54 = vpop.f32.mrb[2].mxu0 }
  0xf6   :  { %v3474_v55 = vpop.f32.mrb[3].mxu0 }
  0xf7   :  { %3135 = vtanh.f32 %v282_v22  ;;  %v2514_v24 = vmul.f32 -1.442695, %v282_v22 }
  0xf9   :  { %3137 = vpow2.f32 %v2514_v24  ;;  %v3476_v56 = vpop.f32.mrb[4].mxu0 }
  0xfa   :  { %v3478_v57 = vpop.f32.mrb[5].mxu0  ;;  %v381_v58 = vpop.f32.mrb[2].mxu1 }
  0xfb   :  { %v2732_v60 = vpop.f32.mrb[3].mxu1 }
  0xfd   :  { %v3480_v59 = vpop.f32.mrb[6].mxu0 }
  0xfe   :  { %v3482_v61 = vpop.f32.mrb[7].mxu0 }
 0x101   :  { %v3136_v23 = vpop.eup %3135 }
 0x102   :  { %292 = vrot.lane.b32.xlu0 %v3136_v23, %s3295_s12 }
 0x103   :  { %v3138_v25 = vpop.eup %3137 }
 0x104   :  { %v286_v26 = vadd.f32 1.0, %v3138_v25 }
 0x106   :  { %3139 = vrcp.f32 %v286_v26 }
 0x110   :  { %v3140_v27 = vpop.eup %3139 }
 0x111   :  { %v290_v30 = vmul.f32 0.0, %v3140_v27 }
 0x174   :  { %v293_v28 = vpop.permute.xlu0 %292 }
 0x175   :  { %v295_v29 = vmul.f32 %v3140_v27, %v293_v28 }
 0x177   :  { %297 = vrot.lane.b32.xlu0 %v295_v29, %s3296_s13 }
 0x1e9   :  { %v298_v31 = vpop.permute.xlu0 %297 }
 0x1ea   :  { %v3406_v32 = vadd.f32 %v298_v31, %v290_v30 }
 0x1ec   :  { %3141 = vtanh.f32 %v3406_v32 }
 0x1f6   :  { %v3142_v51 = vpop.eup %3141 }
 0x1f7   :  { %303 = vrot.lane.b32.xlu1 %v3142_v51, %s3295_s12  ;;  %v161_v51 = vadd.f32 %v3399_v16, %v3474_v55 }
 0x269   :  { %v304_v52 = vpop.permute.xlu1 %303 }
 0x26a   :  { %v306_v53 = vmul.f32 %v3140_v27, %v304_v52 }
 0x26c   :  { %386 = vrot.lane.b32.xlu1 %v306_v53, %s3296_s13 }
 0x2de   :  { %v387_v62 = vpop.permute.xlu1 %386 }
 0x2df   :  { %2742 = vmatmul.mubr.msk.f32.vlgmr.msra.gmra.mrb[8].mxu0 %vm59_vm1, %v387_v62  ;;  %2753 = vmatmul.mubr.msk.f32.vlgmr.msra.gmra.mrb[4].mxu1 %vm59_vm1, %v387_v62 }
 0x2e0   :  { %3015 = vmatpush3.bf16.msra.mxu1 %v3415_v36  ;;  %3009 = vmatpush3.bf16.msra.mxu0 %v3423_v40 }
 0x2e1   :  { %3016 = vmatprep.subr.bf16.mxu1 %v3292_v0  ;;  %3010 = vmatprep.subr.bf16.mxu0 %v3292_v0 }
 0x2e2   :  { %2774 = vmatprep.mubr.msk.f32.mxu1 %vm3293_vm0, %v3294_v1  ;;  %2763 = vmatprep.mubr.msk.f32.mxu0 %vm3293_vm0, %v3294_v1 }
 0x2e4   :  { %3018 = vmatpush3.bf16.msra.mxu1 %v3440_v47  ;;  %3012 = vmatpush3.bf16.msra.mxu0 %v3438_v46 }
 0x2e5   :  { %3019 = vmatprep.subr.bf16.mxu0 %v3292_v0  ;;  %3025 = vmatprep.subr.bf16.mxu1 %v3292_v0 }
 0x3b2   :  { %v456_v3 = vpop.f32.mrb[8].mxu0  ;;  %v562_v4 = vpop.f32.mrb[4].mxu1 }
 0x3b3   :  { %v457_v5 = vadd.f32 %v456_v3, %v381_v58  ;;  %v566_v6 = vadd.f32 %v562_v4, %v156_v63  ;;  %v2743_v7 = vpop.f32.mrb[9].mxu0  ;;  %v2754_v8 = vpop.f32.mrb[5].mxu1 }
 0x3b5   :  { %v460_v10 = vadd.f32 %v3503_v2, %v457_v5  ;;  %3143 = vtanh.f32 %v566_v6  ;;  %v2518_v13 = vmul.f32 -1.442695, %v566_v6 }
 0x3b7   :  { %3145 = vtanh.f32 %v460_v10  ;;  %v2516_v15 = vmul.f32 -1.442695, %v460_v10 }
 0x3b8   :  { %3147 = vpow2.f32 %v2518_v13 }
 0x3b9   :  { %3149 = vpow2.f32 %v2516_v15 }
 0x3bf   :  { %v3144_v11 = vpop.eup %3143 }
 0x3c0   :  { %576 = vrot.lane.b32.xlu1 %v3144_v11, %s3295_s12 }
 0x3c1   :  { %v3146_v12 = vpop.eup %3145 }
 0x3c2   :  { %470 = vrot.lane.b32.xlu0 %v3146_v12, %s3295_s12  ;;  %v3148_v17 = vpop.eup %3147 }
 0x3c3   :  { %v3150_v18 = vpop.eup %3149  ;;  %v570_v19 = vadd.f32 1.0, %v3148_v17 }
 0x3c4   :  { %v464_v20 = vadd.f32 1.0, %v3150_v18 }
 0x3c5   :  { %3151 = vrcp.f32 %v570_v19 }
 0x3c6   :  { %3153 = vrcp.f32 %v464_v20 }
 0x3cf   :  { %v3152_v21 = vpop.eup %3151 }
 0x3d0   :  { %v3154_v24 = vpop.eup %3153  ;;  %v574_v27 = vmul.f32 %v3152_v21, %v3406_v32 }
 0x3d1   :  { %v468_v30 = vmul.f32 0.0, %v3154_v24 }
 0x432   :  { %v577_v22 = vpop.permute.xlu1 %576 }
 0x433   :  { %v579_v23 = vmul.f32 %v3152_v21, %v577_v22 }
 0x434   :  { %v471_v25 = vpop.permute.xlu0 %470 }
 0x435   :  { %v473_v26 = vmul.f32 %v3154_v24, %v471_v25  ;;  %581 = vrot.lane.b32.xlu1 %v579_v23, %s3296_s13 }
 0x437   :  { %475 = vrot.lane.b32.xlu0 %v473_v26, %s3296_s13 }
 0x4a7   :  { %v582_v28 = vpop.permute.xlu1 %581 }
 0x4a8   :  { %v3511_v29 = vadd.f32 %v582_v28, %v574_v27 }
 0x4a9   :  { %v476_v31 = vpop.permute.xlu0 %475 }
 0x4aa   :  { %3155 = vtanh.f32 %v3511_v29  ;;  %v3514_v33 = vadd.f32 %v476_v31, %v468_v30 }
 0x4ac   :  { %3157 = vtanh.f32 %v3514_v33 }
 0x4b4   :  { %v3156_v34 = vpop.eup %3155 }
 0x4b5   :  { %587 = vrot.lane.b32.xlu1 %v3156_v34, %s3295_s12  ;;  %v166_v34 = vadd.f32 %v3472_v54, %v3399_v16 }
 0x4b6   :  { %v3158_v35 = vpop.eup %3157 }
 0x4b7   :  { %481 = vrot.lane.b32.xlu0 %v3158_v35, %s3295_s12 }
 0x527   :  { %v588_v37 = vpop.permute.xlu1 %587 }
 0x528   :  { %v590_v38 = vmul.f32 %v3152_v21, %v588_v37 }
 0x529   :  { %v482_v32 = vpop.permute.xlu0 %481 }
 0x52a   :  { %v484_v39 = vmul.f32 %v3154_v24, %v482_v32  ;;  %672 = vrot.lane.b32.xlu1 %v590_v38, %s3296_s13 }
 0x52c   :  { %486 = vrot.lane.b32.xlu0 %v484_v39, %s3296_s13 }
 0x59c   :  { %v673_v41 = vpop.permute.xlu1 %672 }
 0x59d   :  { %2775 = vmatmul.mubr.msk.f32.vlgmr.msra.gmra.mrb[6].mxu1 %vm59_vm1, %v673_v41 }
 0x59e   :  { %v487_v42 = vpop.permute.xlu0 %486  ;;  %3027 = vmatpush3.bf16.msra.mxu1 %v3423_v40  ;;  %2796 = vmatprep.mubr.msk.f32.mxu1 %vm3293_vm0, %v3294_v1 }
 0x59f   :  { %489 = vst.msk [vmem:[%s3819_s7] sm:$0xff] %vm59_vm1, %v487_v42  ;;  %2764 = vmatmul.mubr.msk.f32.vlgmr.msra.gmra.mrb[10].mxu0 %vm59_vm1, %v487_v42  ;;  %3028 = vmatprep.subr.bf16.mxu1 %v3292_v0 }
 0x5a0   :  { %3021 = vmatpush3.bf16.msra.mxu0 %v3370_v9  ;;  %2785 = vmatprep.mubr.msk.f32.mxu0 %vm3293_vm0, %v3294_v1 }
 0x5a1   :  { %3022 = vmatprep.subr.bf16.mxu0 %v3292_v0 }
 0x5a2   :  { %3030 = vmatpush3.bf16.msra.mxu1 %v3438_v46 }
 0x5a3   :  { %3037 = vmatprep.subr.bf16.mxu1 %v3292_v0 }
 0x5a4   :  { %3024 = vmatpush3.bf16.msra.mxu0 %v3383_v14 }
 0x5a5   :  { %3031 = vmatprep.subr.bf16.mxu0 %v3292_v0 }
 0x5a7   :  { %2786 = vmatmul.mubr.msk.f32.vlgmr.msra.gmra.mrb[12].mxu0 %vm59_vm1, %v673_v41 }
 0x5a8   :  { %3033 = vmatpush3.bf16.msra.mxu0 %v3415_v36  ;;  %2807 = vmatprep.mubr.msk.f32.mxu0 %vm3293_vm0, %v3294_v1 }
 0x5a9   :  { %3034 = vmatprep.subr.bf16.mxu0 %v3292_v0 }
 0x5ac   :  { %3036 = vmatpush3.bf16.msra.mxu0 %v3440_v47 }
 0x5ad   :  { %3043 = vmatprep.subr.bf16.mxu0 %v3292_v0 }
 0x670   :  { %v742_v43 = vpop.f32.mrb[6].mxu1 }
 0x671   :  { %v2776_v44 = vpop.f32.mrb[7].mxu1 }
 0x672   :  { %v667_v45 = vpop.f32.mrb[10].mxu0 }
 0x673   :  { %v743_v48 = vadd.f32 %v742_v43, %v667_v45  ;;  %v2765_v49 = vpop.f32.mrb[11].mxu0 }
 0x675   :  { %v746_v50 = vadd.f32 %v3503_v2, %v743_v48 }
 0x677   :  { %3159 = vtanh.f32 %v746_v50  ;;  %v2521_v63 = vmul.f32 -1.442695, %v746_v50 }
 0x67a   :  { %v849_v52 = vpop.f32.mrb[12].mxu0 }
 0x67b   :  { %v853_v53 = vadd.f32 %v849_v52, %v161_v51  ;;  %v2787_v58 = vpop.f32.mrb[13].mxu0 }
 0x67d   :  { %3161 = vtanh.f32 %v853_v53  ;;  %v2524_v3 = vmul.f32 -1.442695, %v853_v53 }
 0x67e   :  { %3163 = vpow2.f32 %v2521_v63 }
 0x67f   :  { %3165 = vpow2.f32 %v2524_v3 }
 0x681   :  { %v3160_v60 = vpop.eup %3159 }
 0x682   :  { %756 = vrot.lane.b32.xlu0 %v3160_v60, %s3295_s12 }
 0x687   :  { %v3162_v62 = vpop.eup %3161 }
 0x688   :  { %863 = vrot.lane.b32.xlu1 %v3162_v62, %s3295_s12  ;;  %v3164_v4 = vpop.eup %3163 }
 0x689   :  { %v750_v5 = vadd.f32 1.0, %v3164_v4  ;;  %v3166_v6 = vpop.eup %3165 }
 0x68a   :  { %v857_v7 = vadd.f32 1.0, %v3166_v6 }
 0x68b   :  { %3167 = vrcp.f32 %v750_v5 }
 0x68c   :  { %3169 = vrcp.f32 %v857_v7 }
 0x695   :  { %v3168_v55 = vpop.eup %3167 }
 0x696   :  { %v3170_v11 = vpop.eup %3169  ;;  %v754_v15 = vmul.f32 %v3168_v55, %v3514_v33 }
 0x697   :  { %v861_v19 = vmul.f32 %v3170_v11, %v3511_v29 }
 0x6f4   :  { %v757_v8 = vpop.permute.xlu0 %756 }
 0x6f5   :  { %v759_v10 = vmul.f32 %v3168_v55, %v757_v8 }
 0x6f7   :  { %761 = vrot.lane.b32.xlu0 %v759_v10, %s3296_s13 }
 0x6fa   :  { %v864_v12 = vpop.permute.xlu1 %863 }
 0x6fb   :  { %v866_v13 = vmul.f32 %v3170_v11, %v864_v12 }
 0x6fd   :  { %868 = vrot.lane.b32.xlu1 %v866_v13, %s3296_s13 }
 0x769   :  { %v762_v17 = vpop.permute.xlu0 %761 }
 0x76a   :  { %v3554_v18 = vadd.f32 %v762_v17, %v754_v15 }
 0x76c   :  { %3171 = vtanh.f32 %v3554_v18 }
 0x76f   :  { %v869_v20 = vpop.permute.xlu1 %868 }
 0x770   :  { %v3558_v21 = vadd.f32 %v869_v20, %v861_v19 }
 0x772   :  { %3173 = vtanh.f32 %v3558_v21 }
 0x776   :  { %v3172_v22 = vpop.eup %3171 }
 0x777   :  { %767 = vrot.lane.b32.xlu0 %v3172_v22, %s3295_s12 }
 0x77c   :  { %v3174_v23 = vpop.eup %3173 }
 0x77d   :  { %874 = vrot.lane.b32.xlu1 %v3174_v23, %s3295_s12 }
 0x7e9   :  { %v768_v24 = vpop.permute.xlu0 %767 }
 0x7ea   :  { %v770_v25 = vmul.f32 %v3168_v55, %v768_v24  ;;  %v171_v24 = vadd.f32 %v3399_v16, %v3478_v57 }
 0x7ec   :  { %772 = vrot.lane.b32.xlu0 %v770_v25, %s3296_s13 }
 0x7ef   :  { %v875_v26 = vpop.permute.xlu1 %874 }
 0x7f0   :  { %v877_v27 = vmul.f32 %v3170_v11, %v875_v26 }
 0x7f2   :  { %959 = vrot.lane.b32.xlu1 %v877_v27, %s3296_s13 }
 0x85e   :  { %v773_v28 = vpop.permute.xlu0 %772 }
 0x85f   :  { %2522 = vst.msk [vmem:[%s3819_s7 + $0x8] sm:$0xff] %vm59_vm1, %v773_v28  ;;  %2797 = vmatmul.mubr.msk.f32.vlgmr.msra.gmra.mrb[8].mxu1 %vm59_vm1, %v773_v28 }
 0x860   :  { %3039 = vmatpush3.bf16.msra.mxu1 %v3370_v9  ;;  %2818 = vmatprep.mubr.msk.f32.mxu1 %vm3293_vm0, %v3294_v1 }
 0x861   :  { %3040 = vmatprep.subr.bf16.mxu1 %v3292_v0 }
 0x864   :  { %3042 = vmatpush3.bf16.msra.mxu1 %v3383_v14  ;;  %v960_v29 = vpop.permute.xlu1 %959 }
 0x865   :  { %2808 = vmatmul.mubr.msk.f32.vlgmr.msra.gmra.mrb[14].mxu0 %vm59_vm1, %v960_v29  ;;  %3049 = vmatprep.subr.bf16.mxu1 %v3292_v0 }
 0x866   :  { %3045 = vmatpush3.bf16.msra.mxu0 %v3423_v40  ;;  %2829 = vmatprep.mubr.msk.f32.mxu0 %vm3293_vm0, %v3294_v1 }
 0x867   :  { %2819 = vmatmul.mubr.msk.f32.vlgmr.msra.gmra.mrb[10].mxu1 %vm59_vm1, %v960_v29  ;;  %3046 = vmatprep.subr.bf16.mxu0 %v3292_v0 }
 0x868   :  { %3051 = vmatpush3.bf16.msra.mxu1 %v3415_v36  ;;  %2840 = vmatprep.mubr.msk.f32.mxu1 %vm3293_vm0, %v3294_v1 }
 0x869   :  { %3052 = vmatprep.subr.bf16.mxu1 %v3292_v0 }
 0x86a   :  { %3048 = vmatpush3.bf16.msra.mxu0 %v3438_v46 }
 0x86b   :  { %3055 = vmatprep.subr.bf16.mxu0 %v3292_v0 }
 0x86c   :  { %3054 = vmatpush3.bf16.msra.mxu1 %v3440_v47 }
 0x86d   :  { %3061 = vmatprep.subr.bf16.mxu1 %v3292_v0 }
 0x932   :  { %v954_v30 = vpop.f32.mrb[8].mxu1 }
 0x933   :  { %v2798_v31 = vpop.f32.mrb[9].mxu1 }
 0x938   :  { %v1029_v33 = vpop.f32.mrb[14].mxu0 }
 0x939   :  { %v1030_v35 = vadd.f32 %v1029_v33, %v954_v30  ;;  %v2809_v37 = vpop.f32.mrb[15].mxu0 }
 0x93a   :  { %v1136_v38 = vpop.f32.mrb[10].mxu1 }
 0x93b   :  { %v1033_v32 = vadd.f32 %v3503_v2, %v1030_v35  ;;  %v1140_v39 = vadd.f32 %v1136_v38, %v166_v34  ;;  %v2820_v41 = vpop.f32.mrb[11].mxu1 }
 0x93d   :  { %3175 = vtanh.f32 %v1033_v32  ;;  %v2527_v44 = vmul.f32 -1.442695, %v1033_v32  ;;  %v2530_v45 = vmul.f32 -1.442695, %v1140_v39 }
 0x93e   :  { %3177 = vtanh.f32 %v1140_v39 }
 0x93f   :  { %3179 = vpow2.f32 %v2527_v44 }
 0x940   :  { %3181 = vpow2.f32 %v2530_v45 }
 0x947   :  { %v3176_v42 = vpop.eup %3175 }
 0x948   :  { %v3178_v43 = vpop.eup %3177  ;;  %1043 = vrot.lane.b32.xlu0 %v3176_v42, %s3295_s12 }
 0x949   :  { %1150 = vrot.lane.b32.xlu1 %v3178_v43, %s3295_s12  ;;  %v3180_v54 = vpop.eup %3179 }
 0x94a   :  { %v3182_v48 = vpop.eup %3181  ;;  %v1037_v49 = vadd.f32 1.0, %v3180_v54 }
 0x94b   :  { %v1144_v50 = vadd.f32 1.0, %v3182_v48 }
 0x94c   :  { %3183 = vrcp.f32 %v1037_v49 }
 0x94d   :  { %3185 = vrcp.f32 %v1144_v50 }
 0x956   :  { %v3184_v51 = vpop.eup %3183 }
 0x957   :  { %v3186_v53 = vpop.eup %3185  ;;  %v1041_v63 = vmul.f32 %v3184_v51, %v3554_v18 }
 0x958   :  { %v1148_v3 = vmul.f32 %v3186_v53, %v3558_v21 }
 0x9ba   :  { %v1044_v52 = vpop.permute.xlu0 %1043 }
 0x9bb   :  { %v1151_v58 = vpop.permute.xlu1 %1150  ;;  %v1046_v60 = vmul.f32 %v3184_v51, %v1044_v52 }
 0x9bc   :  { %v1153_v62 = vmul.f32 %v3186_v53, %v1151_v58 }
 0x9bd   :  { %1048 = vrot.lane.b32.xlu0 %v1046_v60, %s3296_s13 }
 0x9be   :  { %1155 = vrot.lane.b32.xlu1 %v1153_v62, %s3296_s13 }
 0xa2f   :  { %v1049_v4 = vpop.permute.xlu0 %1048 }
 0xa30   :  { %v1156_v5 = vpop.permute.xlu1 %1155  ;;  %v3599_v6 = vadd.f32 %v1049_v4, %v1041_v63 }
 0xa31   :  { %v3601_v7 = vadd.f32 %v1156_v5, %v1148_v3 }
 0xa32   :  { %3187 = vtanh.f32 %v3599_v6 }
 0xa33   :  { %3189 = vtanh.f32 %v3601_v7 }
 0xa3c   :  { %v3188_v55 = vpop.eup %3187 }
 0xa3d   :  { %v3190_v8 = vpop.eup %3189  ;;  %1054 = vrot.lane.b32.xlu0 %v3188_v55, %s3295_s12 }
 0xa3e   :  { %1161 = vrot.lane.b32.xlu1 %v3190_v8, %s3295_s12 }
 0xaaf   :  { %v1055_v10 = vpop.permute.xlu0 %1054 }
 0xab0   :  { %v1162_v11 = vpop.permute.xlu1 %1161  ;;  %v1057_v12 = vmul.f32 %v3184_v51, %v1055_v10 }
 0xab1   :  { %v1164_v13 = vmul.f32 %v3186_v53, %v1162_v11 }
 0xab2   :  { %1059 = vrot.lane.b32.xlu0 %v1057_v12, %s3296_s13 }
 0xab3   :  { %1246 = vrot.lane.b32.xlu1 %v1164_v13, %s3296_s13 }
 0xb24   :  { %v1060_v15 = vpop.permute.xlu0 %1059 }
 0xb25   :  { %v1247_v17 = vpop.permute.xlu1 %1246  ;;  %2528 = vst.msk [vmem:[%s3819_s7 + $0x10] sm:$0xff] %vm59_vm1, %v1060_v15  ;;  %2830 = vmatmul.mubr.msk.f32.vlgmr.msra.gmra.mrb[16].mxu0 %vm59_vm1, %v1060_v15 }
 0xb26   :  { %2841 = vmatmul.mubr.msk.f32.vlgmr.msra.gmra.mrb[12].mxu1 %vm59_vm1, %v1247_v17  ;;  %3057 = vmatpush3.bf16.msra.mxu0 %v3370_v9 }
 0xb27   :  { %3058 = vmatprep.subr.bf16.mxu0 %v3292_v0  ;;  %2851 = vmatprep.mubr.msk.f32.mxu0 %vm3293_vm0, %v3294_v1 }
 0xb28   :  { %3063 = vmatpush3.bf16.msra.mxu1 %v3423_v40  ;;  %2862 = vmatprep.mubr.msk.f32.mxu1 %vm3293_vm0, %v3294_v1 }
 0xb29   :  { %3064 = vmatprep.subr.bf16.mxu1 %v3292_v0 }
 0xb2a   :  { %3060 = vmatpush3.bf16.msra.mxu0 %v3383_v14 }
 0xb2b   :  { %3067 = vmatprep.subr.bf16.mxu0 %v3292_v0 }
 0xb2c   :  { %3066 = vmatpush3.bf16.msra.mxu1 %v3438_v46 }
 0xb2d   :  { %2852 = vmatmul.mubr.msk.f32.vlgmr.msra.gmra.mrb[18].mxu0 %vm59_vm1, %v1247_v17  ;;  %3073 = vmatprep.subr.bf16.mxu1 %v3292_v0 }
 0xb2e   :  { %3069 = vmatpush3.bf16.msra.mxu0 %v3415_v36  ;;  %2873 = vmatprep.mubr.msk.f32.mxu0 %vm3293_vm0, %v3294_v1 }
 0xb2f   :  { %3070 = vmatprep.subr.bf16.mxu0 %v3292_v0 }
 0xb32   :  { %3072 = vmatpush3.bf16.msra.mxu0 %v3440_v47 }
 0xb33   :  { %3079 = vmatprep.subr.bf16.mxu0 %v3292_v0 }
 0xbf8   :  { %v1241_v18 = vpop.f32.mrb[16].mxu0 }
 0xbf9   :  { %v1316_v19 = vpop.f32.mrb[12].mxu1  ;;  %v2831_v20 = vpop.f32.mrb[17].mxu0 }
 0xbfa   :  { %v1317_v21 = vadd.f32 %v1316_v19, %v1241_v18  ;;  %v2842_v22 = vpop.f32.mrb[13].mxu1 }
 0xbfc   :  { %v1320_v23 = vadd.f32 %v3503_v2, %v1317_v21 }
 0xbfe   :  { %3191 = vtanh.f32 %v1320_v23  ;;  %v2533_v30 = vmul.f32 -1.442695, %v1320_v23 }
 0xc00   :  { %v1423_v25 = vpop.f32.mrb[18].mxu0 }
 0xc01   :  { %v1427_v26 = vadd.f32 %v1423_v25, %v171_v24  ;;  %v2853_v27 = vpop.f32.mrb[19].mxu0 }
 0xc03   :  { %3193 = vtanh.f32 %v1427_v26  ;;  %v2536_v31 = vmul.f32 -1.442695, %v1427_v26 }
 0xc04   :  { %3195 = vpow2.f32 %v2533_v30 }
 0xc05   :  { %3197 = vpow2.f32 %v2536_v31 }
 0xc08   :  { %v3192_v28 = vpop.eup %3191 }
 0xc09   :  { %1330 = vrot.lane.b32.xlu0 %v3192_v28, %s3295_s12 }
 0xc0d   :  { %v3194_v29 = vpop.eup %3193 }
 0xc0e   :  { %1437 = vrot.lane.b32.xlu1 %v3194_v29, %s3295_s12  ;;  %v3196_v33 = vpop.eup %3195 }
 0xc0f   :  { %v1324_v34 = vadd.f32 1.0, %v3196_v33  ;;  %v3198_v35 = vpop.eup %3197 }
 0xc10   :  { %v1431_v37 = vadd.f32 1.0, %v3198_v35 }
 0xc11   :  { %3199 = vrcp.f32 %v1324_v34 }
 0xc12   :  { %3201 = vrcp.f32 %v1431_v37 }
 0xc1b   :  { %v3200_v57 = vpop.eup %3199 }
 0xc1c   :  { %v3202_v39 = vpop.eup %3201  ;;  %v1328_v43 = vmul.f32 %v3200_v57, %v3599_v6 }
 0xc1d   :  { %v1435_v54 = vmul.f32 %v3202_v39, %v3601_v7 }
 0xc7b   :  { %v1331_v38 = vpop.permute.xlu0 %1330 }
 0xc7c   :  { %v1333_v32 = vmul.f32 %v3200_v57, %v1331_v38 }
 0xc7e   :  { %1335 = vrot.lane.b32.xlu0 %v1333_v32, %s3296_s13 }
 0xc80   :  { %v1438_v41 = vpop.permute.xlu1 %1437 }
 0xc81   :  { %v1440_v42 = vmul.f32 %v3202_v39, %v1438_v41 }
 0xc83   :  { %1442 = vrot.lane.b32.xlu1 %v1440_v42, %s3296_s13 }
 0xcf0   :  { %v1336_v44 = vpop.permute.xlu0 %1335 }
 0xcf1   :  { %v3642_v45 = vadd.f32 %v1336_v44, %v1328_v43 }
 0xcf3   :  { %3203 = vtanh.f32 %v3642_v45 }
 0xcf5   :  { %v1443_v48 = vpop.permute.xlu1 %1442 }
 0xcf6   :  { %v3646_v49 = vadd.f32 %v1443_v48, %v1435_v54 }
 0xcf8   :  { %3205 = vtanh.f32 %v3646_v49 }
 0xcfd   :  { %v3204_v50 = vpop.eup %3203 }
 0xcfe   :  { %1341 = vrot.lane.b32.xlu0 %v3204_v50, %s3295_s12 }
 0xd02   :  { %v3206_v51 = vpop.eup %3205 }
 0xd03   :  { %1448 = vrot.lane.b32.xlu1 %v3206_v51, %s3295_s12 }
 0xd70   :  { %v1342_v52 = vpop.permute.xlu0 %1341 }
 0xd71   :  { %v1344_v53 = vmul.f32 %v3200_v57, %v1342_v52 }
 0xd73   :  { %1346 = vrot.lane.b32.xlu0 %v1344_v53, %s3296_s13 }
 0xd75   :  { %v1449_v58 = vpop.permute.xlu1 %1448 }
 0xd76   :  { %v1451_v60 = vmul.f32 %v3202_v39, %v1449_v58 }
 0xd78   :  { %1533 = vrot.lane.b32.xlu1 %v1451_v60, %s3296_s13 }
 0xde5   :  { %v1347_v62 = vpop.permute.xlu0 %1346 }
 0xde6   :  { %2534 = vst.msk [vmem:[%s3819_s7 + $0x18] sm:$0xff] %vm59_vm1, %v1347_v62  ;;  %2863 = vmatmul.mubr.msk.f32.vlgmr.msra.gmra.mrb[14].mxu1 %vm59_vm1, %v1347_v62 }
 0xde7   :  { %3075 = vmatpush3.bf16.msra.mxu1 %v3370_v9  ;;  %2884 = vmatprep.mubr.msk.f32.mxu1 %vm3293_vm0, %v3294_v1 }
 0xde8   :  { %3076 = vmatprep.subr.bf16.mxu1 %v3292_v0 }
 0xdea   :  { %v1534_v63 = vpop.permute.xlu1 %1533 }
 0xdeb   :  { %3078 = vmatpush3.bf16.msra.mxu1 %v3383_v14  ;;  %2874 = vmatmul.mubr.msk.f32.vlgmr.msra.gmra.mrb[20].mxu0 %vm59_vm1, %v1534_v63 }
 0xdec   :  { %3081 = vmatpush3.bf16.msra.mxu0 %v3423_v40  ;;  %3085 = vmatprep.subr.bf16.mxu1 %v3292_v0 }
 0xded   :  { %3082 = vmatprep.subr.bf16.mxu0 %v3292_v0  ;;  %2895 = vmatprep.mubr.msk.f32.mxu0 %vm3293_vm0, %v3294_v1 }
 0xdee   :  { %2885 = vmatmul.mubr.msk.f32.vlgmr.msra.gmra.mrb[16].mxu1 %vm59_vm1, %v1534_v63 }
 0xdef   :  { %3087 = vmatpush3.bf16.msra.mxu1 %v3415_v36  ;;  %2906 = vmatprep.mubr.msk.f32.mxu1 %vm3293_vm0, %v3294_v1  ;;  %v176_v36 = vadd.f32 %v3476_v56, %v3399_v16 }
 0xdf0   :  { %3084 = vmatpush3.bf16.msra.mxu0 %v3438_v46  ;;  %3088 = vmatprep.subr.bf16.mxu1 %v3292_v0 }
 0xdf1   :  { %3091 = vmatprep.subr.bf16.mxu0 %v3292_v0 }
 0xdf3   :  { %3090 = vmatpush3.bf16.msra.mxu1 %v3440_v47 }
 0xdf4   :  { %3097 = vmatprep.subr.bf16.mxu1 %v3292_v0 }
 0xeb9   :  { %v1528_v3 = vpop.f32.mrb[14].mxu1 }
 0xeba   :  { %v2864_v4 = vpop.f32.mrb[15].mxu1 }
 0xebe   :  { %v1603_v5 = vpop.f32.mrb[20].mxu0 }
 0xebf   :  { %v1604_v6 = vadd.f32 %v1603_v5, %v1528_v3  ;;  %v2875_v7 = vpop.f32.mrb[21].mxu0 }
 0xec1   :  { %v1607_v55 = vadd.f32 %v3503_v2, %v1604_v6  ;;  %v1710_v8 = vpop.f32.mrb[16].mxu1 }
 0xec2   :  { %v1714_v10 = vadd.f32 %v1710_v8, %v176_v36  ;;  %v2886_v11 = vpop.f32.mrb[17].mxu1 }
 0xec3   :  { %3207 = vtanh.f32 %v1607_v55  ;;  %v2539_v47 = vmul.f32 -1.442695, %v1607_v55  ;;  %v2027_v11 = vld [vmem:[%s3816_s4 + $0x8] sm:$0xff] }
 0xec4   :  { %3209 = vtanh.f32 %v1714_v10  ;;  %v2542_v15 = vmul.f32 -1.442695, %v1714_v10  ;;  %v2026_v10 = vld [vmem:[%s3816_s4] sm:$0xff] }
 0xec5   :  { %3211 = vpow2.f32 %v2539_v47 }
 0xec6   :  { %3213 = vpow2.f32 %v2542_v15  ;;  %v2028_v15 = vld [vmem:[%s3816_s4 + $0x10] sm:$0xff] }
 0xecd   :  { %v3208_v12 = vpop.eup %3207 }
 0xece   :  { %v3210_v13 = vpop.eup %3209  ;;  %1617 = vrot.lane.b32.xlu0 %v3208_v12, %s3295_s12  ;;  %v3104_v12 = vpack.c.bf16 %v2027_v11, %v2026_v10 }
 0xecf   :  { %1724 = vrot.lane.b32.xlu1 %v3210_v13, %s3295_s12  ;;  %v3212_v17 = vpop.eup %3211 }
 0xed0   :  { %v3214_v18 = vpop.eup %3213  ;;  %v1611_v56 = vadd.f32 1.0, %v3212_v17  ;;  %v2029_v17 = vld [vmem:[%s3816_s4 + $0x18] sm:$0xff] }
 0xed1   :  { %v1718_v19 = vadd.f32 1.0, %v3214_v18  ;;  %v3107_v18 = vpack.c.bf16 %v2029_v17, %v2028_v15  ;;  %v3264_v17 = vld [vmem:[%s3818_s6] ss:$0 sm:$0xff] }
 0xed2   :  { %3215 = vrcp.f32 %v1611_v56 }
 0xed3   :  { %3217 = vrcp.f32 %v1718_v19 }
 0xedc   :  { %v3216_v20 = vpop.eup %3215 }
 0xedd   :  { %v3218_v22 = vpop.eup %3217  ;;  %v1615_v26 = vmul.f32 %v3216_v20, %v3642_v45 }
 0xede   :  { %v1722_v27 = vmul.f32 %v3218_v22, %v3646_v49 }
 0xf40   :  { %v1618_v21 = vpop.permute.xlu0 %1617 }
 0xf41   :  { %v1725_v23 = vpop.permute.xlu1 %1724  ;;  %v1620_v24 = vmul.f32 %v3216_v20, %v1618_v21 }
 0xf42   :  { %v1727_v25 = vmul.f32 %v3218_v22, %v1725_v23  ;;  %v2215_v23 = vld [vmem:[%s3814_s2 + $0x8] sm:$0xff] }
 0xf43   :  { %1622 = vrot.lane.b32.xlu0 %v1620_v24, %s3296_s13 }
 0xf44   :  { %1729 = vrot.lane.b32.xlu1 %v1727_v25, %s3296_s13  ;;  %v2216_v25 = vld [vmem:[%s3814_s2 + $0x10] sm:$0xff] }
 0xfb5   :  { %v1623_v28 = vpop.permute.xlu0 %1622 }
 0xfb6   :  { %v1730_v29 = vpop.permute.xlu1 %1729  ;;  %v3687_v30 = vadd.f32 %v1623_v28, %v1615_v26  ;;  %v2217_v26 = vld [vmem:[%s3814_s2 + $0x18] sm:$0xff] }
 0xfb7   :  { %v3689_v31 = vadd.f32 %v1730_v29, %v1722_v27  ;;  %v3113_v28 = vpack.c.bf16 %v2217_v26, %v2216_v25 }
 0xfb8   :  { %3219 = vtanh.f32 %v3687_v30 }
 0xfb9   :  { %3221 = vtanh.f32 %v3689_v31 }
 0xfc2   :  { %v3220_v33 = vpop.eup %3219 }
 0xfc3   :  { %v3222_v34 = vpop.eup %3221  ;;  %1628 = vrot.lane.b32.xlu0 %v3220_v33, %s3295_s12 }
 0xfc4   :  { %1735 = vrot.lane.b32.xlu1 %v3222_v34, %s3295_s12 }
0x1035   :  { %v1629_v35 = vpop.permute.xlu0 %1628 }
0x1036   :  { %v1736_v37 = vpop.permute.xlu1 %1735  ;;  %v1631_v57 = vmul.f32 %v3216_v20, %v1629_v35 }
0x1037   :  { %v1738_v38 = vmul.f32 %v3218_v22, %v1736_v37  ;;  %v2214_v22 = vld [vmem:[%s3814_s2] sm:$0xff] }
0x1038   :  { %1633 = vrot.lane.b32.xlu0 %v1631_v57, %s3296_s13  ;;  %v3110_v24 = vpack.c.bf16 %v2215_v23, %v2214_v22  ;;  %v3263_v37 = vld [vmem:[%s3815_s3] ss:$0 sm:$0xff] }
0x1039   :  { %1820 = vrot.lane.b32.xlu1 %v1738_v38, %s3296_s13  ;;  %v186_v57 = vadd.f32 %v3263_v37, %v3480_v59 }
0x10aa   :  { %v1634_v32 = vpop.permute.xlu0 %1633 }
0x10ab   :  { %v1821_v39 = vpop.permute.xlu1 %1820  ;;  %2540 = vst.msk [vmem:[%s3819_s7 + $0x20] sm:$0xff] %vm59_vm1, %v1634_v32  ;;  %2896 = vmatmul.mubr.msk.f32.vlgmr.msra.gmra.mrb[22].mxu0 %vm59_vm1, %v1634_v32 }
0x10ac   :  { %2907 = vmatmul.mubr.msk.f32.vlgmr.msra.gmra.mrb[18].mxu1 %vm59_vm1, %v1821_v39  ;;  %3093 = vmatpush3.bf16.msra.mxu0 %v3370_v9 }
0x10ad   :  { %3094 = vmatprep.subr.bf16.mxu0 %v3292_v0  ;;  %2917 = vmatprep.mubr.msk.f32.mxu0 %vm3293_vm0, %v3294_v1 }
0x10ae   :  { %3099 = vmatpush3.bf16.msra.mxu1 %v3423_v40  ;;  %2928 = vmatprep.mubr.msk.f32.mxu1 %vm3293_vm0, %v3294_v1 }
0x10af   :  { %3100 = vmatprep.subr.bf16.mxu1 %v3292_v0 }
0x10b0   :  { %3096 = vmatpush3.bf16.msra.mxu0 %v3383_v14  ;;  %v181_v14 = vadd.f32 %v3399_v16, %v3482_v61 }
0x10b1   :  { %3103 = vmatprep.subr.bf16.mxu0 %v3292_v0 }
0x10b2   :  { %3102 = vmatpush3.bf16.msra.mxu1 %v3438_v46 }
0x10b3   :  { %2918 = vmatmul.mubr.msk.f32.vlgmr.msra.gmra.mrb[24].mxu0 %vm59_vm1, %v1821_v39  ;;  %3109 = vmatprep.subr.bf16.mxu1 %v3292_v0 }
0x10b4   :  { %2939 = vmatprep.mubr.msk.f32.mxu0 %vm3293_vm0, %v3294_v1  ;;  %3105 = vmatpush3.bf16.msra.mxu0 %v3104_v12 }
0x10b5   :  { %3106 = vmatprep.subr.bf16.mxu0 %v3292_v0 }
0x10b8   :  { %3108 = vmatpush3.bf16.msra.mxu0 %v3107_v18 }
0x10b9   :  { %3115 = vmatprep.subr.bf16.mxu0 %v3292_v0 }
0x117e   :  { %v1815_v9 = vpop.f32.mrb[22].mxu0 }
0x117f   :  { %v1890_v40 = vpop.f32.mrb[18].mxu1  ;;  %v2897_v41 = vpop.f32.mrb[23].mxu0 }
0x1180   :  { %v1891_v42 = vadd.f32 %v1890_v40, %v1815_v9  ;;  %v2908_v43 = vpop.f32.mrb[19].mxu1 }
0x1182   :  { %v1894_v44 = vadd.f32 %v3503_v2, %v1891_v42 }
0x1184   :  { %3223 = vtanh.f32 %v1894_v44  ;;  %v2545_v50 = vmul.f32 -1.442695, %v1894_v44 }
0x1186   :  { %v1997_v45 = vpop.f32.mrb[24].mxu0 }
0x1187   :  { %v2001_v46 = vadd.f32 %v1997_v45, %v181_v14  ;;  %v2919_v54 = vpop.f32.mrb[25].mxu0 }
0x1189   :  { %3225 = vtanh.f32 %v2001_v46  ;;  %v2548_v51 = vmul.f32 -1.442695, %v2001_v46 }
0x118a   :  { %3227 = vpow2.f32 %v2545_v50 }
0x118b   :  { %3229 = vpow2.f32 %v2548_v51 }
0x118e   :  { %v3224_v48 = vpop.eup %3223 }
0x118f   :  { %1904 = vrot.lane.b32.xlu0 %v3224_v48, %s3295_s12 }
0x1193   :  { %v3226_v49 = vpop.eup %3225 }
0x1194   :  { %2011 = vrot.lane.b32.xlu1 %v3226_v49, %s3295_s12  ;;  %v3228_v52 = vpop.eup %3227 }
0x1195   :  { %v1898_v53 = vadd.f32 1.0, %v3228_v52  ;;  %v3230_v58 = vpop.eup %3229 }
0x1196   :  { %v2005_v60 = vadd.f32 1.0, %v3230_v58 }
0x1197   :  { %3231 = vrcp.f32 %v1898_v53 }
0x1198   :  { %3233 = vrcp.f32 %v2005_v60 }
0x11a1   :  { %v3232_v16 = vpop.eup %3231 }
0x11a2   :  { %v3234_v63 = vpop.eup %3233  ;;  %v1902_v5 = vmul.f32 %v3232_v16, %v3687_v30 }
0x11a3   :  { %v2009_v36 = vmul.f32 %v3234_v63, %v3689_v31 }
0x1201   :  { %v1905_v61 = vpop.permute.xlu0 %1904 }
0x1202   :  { %v1907_v62 = vmul.f32 %v3232_v16, %v1905_v61  ;;  %v2318_v61 = vld [vmem:[#allocation3 + $0x8] sm:$0xff] }
0x1204   :  { %1909 = vrot.lane.b32.xlu0 %v1907_v62, %s3296_s13  ;;  %v2319_v62 = vld [vmem:[#allocation3 + $0x10] sm:$0xff] }
0x1206   :  { %v2012_v3 = vpop.permute.xlu1 %2011 }
0x1207   :  { %v2014_v4 = vmul.f32 %v3234_v63, %v2012_v3  ;;  %v2320_v3 = vld [vmem:[#allocation3 + $0x18] sm:$0xff] }
0x1209   :  { %2016 = vrot.lane.b32.xlu1 %v2014_v4, %s3296_s13  ;;  %v3119_v4 = vpack.c.bf16 %v2320_v3, %v2319_v62 }
0x1276   :  { %v1910_v6 = vpop.permute.xlu0 %1909 }
0x1277   :  { %v3726_v7 = vadd.f32 %v1910_v6, %v1902_v5 }
0x1279   :  { %3235 = vtanh.f32 %v3726_v7 }
0x127b   :  { %v2017_v55 = vpop.permute.xlu1 %2016 }
0x127c   :  { %v3730_v8 = vadd.f32 %v2017_v55, %v2009_v36 }
0x127e   :  { %3237 = vtanh.f32 %v3730_v8 }
0x1283   :  { %v3236_v13 = vpop.eup %3235 }
0x1284   :  { %1915 = vrot.lane.b32.xlu0 %v3236_v13, %s3295_s12 }
0x1288   :  { %v3238_v47 = vpop.eup %3237 }
0x1289   :  { %2022 = vrot.lane.b32.xlu1 %v3238_v47, %s3295_s12 }
0x12f6   :  { %v1916_v56 = vpop.permute.xlu0 %1915 }
0x12f7   :  { %v1918_v19 = vmul.f32 %v3232_v16, %v1916_v56  ;;  %v2317_v16 = vld [vmem:[#allocation3] sm:$0xff] }
0x12f9   :  { %1920 = vrot.lane.b32.xlu0 %v1918_v19, %s3296_s13 }
0x12fb   :  { %v2023_v20 = vpop.permute.xlu1 %2022 }
0x12fc   :  { %v2025_v21 = vmul.f32 %v3234_v63, %v2023_v20  ;;  %v3116_v63 = vpack.c.bf16 %v2318_v61, %v2317_v16 }
0x12fe   :  { %2107 = vrot.lane.b32.xlu1 %v2025_v21, %s3296_s13 }
0x136b   :  { %v1921_v27 = vpop.permute.xlu0 %1920 }
0x136c   :  { %2546 = vst.msk [vmem:[%s3819_s7 + $0x28] sm:$0xff] %vm59_vm1, %v1921_v27  ;;  %2929 = vmatmul.mubr.msk.f32.vlgmr.msra.gmra.mrb[20].mxu1 %vm59_vm1, %v1921_v27 }
0x136d   :  { %3111 = vmatpush3.bf16.msra.mxu1 %v3110_v24  ;;  %2950 = vmatprep.mubr.msk.f32.mxu1 %vm3293_vm0, %v3294_v1 }
0x136e   :  { %3112 = vmatprep.subr.bf16.mxu1 %v3292_v0 }
0x1370   :  { %v2108_v29 = vpop.permute.xlu1 %2107 }
0x1371   :  { %3114 = vmatpush3.bf16.msra.mxu1 %v3113_v28  ;;  %2940 = vmatmul.mubr.msk.f32.vlgmr.msra.gmra.mrb[26].mxu0 %vm59_vm1, %v2108_v29 }
0x1372   :  { %3121 = vmatprep.subr.bf16.mxu1 %v3292_v0  ;;  %2961 = vmatprep.mubr.msk.f32.mxu0 %vm3293_vm0, %v3294_v1 }
0x1373   :  { %3117 = vmatpush3.bf16.msra.mxu0 %v3116_v63 }
0x1374   :  { %2951 = vmatmul.mubr.msk.f32.vlgmr.msra.gmra.mrb[22].mxu1 %vm59_vm1, %v2108_v29  ;;  %3118 = vmatprep.subr.bf16.mxu0 %v3292_v0 }
0x1375   :  { %3123 = vmatpush3.bf16.msra.mxu1 %v3104_v12  ;;  %2972 = vmatprep.mubr.msk.f32.mxu1 %vm3293_vm0, %v3294_v1 }
0x1376   :  { %3124 = vmatprep.subr.bf16.mxu1 %v3292_v0 }
0x1377   :  { %3120 = vmatpush3.bf16.msra.mxu0 %v3119_v4 }
0x1379   :  { %3126 = vmatpush3.bf16.msra.mxu1 %v3107_v18 }
0x143f   :  { %v2102_v30 = vpop.f32.mrb[20].mxu1 }
0x1440   :  { %v2930_v31 = vpop.f32.mrb[21].mxu1 }
0x1444   :  { %v2177_v33 = vpop.f32.mrb[26].mxu0 }
0x1445   :  { %v2178_v34 = vadd.f32 %v2177_v33, %v2102_v30  ;;  %v2941_v35 = vpop.f32.mrb[27].mxu0 }
0x1447   :  { %v2181_v38 = vadd.f32 %v3503_v2, %v2178_v34  ;;  %v2284_v32 = vpop.f32.mrb[22].mxu1 }
0x1448   :  { %v2288_v39 = vadd.f32 %v2284_v32, %v186_v57  ;;  %v2952_v9 = vpop.f32.mrb[23].mxu1 }
0x1449   :  { %3239 = vtanh.f32 %v2181_v38  ;;  %v2551_v41 = vmul.f32 -1.442695, %v2181_v38 }
0x144a   :  { %3241 = vtanh.f32 %v2288_v39  ;;  %v2554_v42 = vmul.f32 -1.442695, %v2288_v39 }
0x144b   :  { %3243 = vpow2.f32 %v2551_v41 }
0x144c   :  { %3245 = vpow2.f32 %v2554_v42 }
0x1453   :  { %v3240_v1 = vpop.eup %3239 }
0x1454   :  { %v3242_v40 = vpop.eup %3241  ;;  %2191 = vrot.lane.b32.xlu0 %v3240_v1, %s3295_s12 }
0x1455   :  { %2298 = vrot.lane.b32.xlu1 %v3242_v40, %s3295_s12  ;;  %v3244_v43 = vpop.eup %3243 }
0x1456   :  { %v3246_v44 = vpop.eup %3245  ;;  %v2185_v59 = vadd.f32 1.0, %v3244_v43 }
0x1457   :  { %v2292_v14 = vadd.f32 1.0, %v3246_v44 }
0x1458   :  { %3247 = vrcp.f32 %v2185_v59 }
0x1459   :  { %3249 = vrcp.f32 %v2292_v14 }
0x1462   :  { %v3248_v2 = vpop.eup %3247 }
0x1463   :  { %v3250_v46 = vpop.eup %3249  ;;  %v2189_v50 = vmul.f32 %v3248_v2, %v3726_v7 }
0x1464   :  { %v2296_v51 = vmul.f32 %v3250_v46, %v3730_v8 }
0x14c6   :  { %v2192_v45 = vpop.permute.xlu0 %2191 }
0x14c7   :  { %v2299_v54 = vpop.permute.xlu1 %2298  ;;  %v2194_v48 = vmul.f32 %v3248_v2, %v2192_v45 }
0x14c8   :  { %v2301_v49 = vmul.f32 %v3250_v46, %v2299_v54 }
0x14c9   :  { %2196 = vrot.lane.b32.xlu0 %v2194_v48, %s3296_s13 }
0x14ca   :  { %2303 = vrot.lane.b32.xlu1 %v2301_v49, %s3296_s13 }
0x153b   :  { %v2197_v52 = vpop.permute.xlu0 %2196 }
0x153c   :  { %v2304_v53 = vpop.permute.xlu1 %2303  ;;  %v2199_v58 = vadd.f32 %v2197_v52, %v2189_v50 }
0x153d   :  { %v2306_v60 = vadd.f32 %v2304_v53, %v2296_v51 }
0x153e   :  { %3251 = vtanh.f32 %v2199_v58 }
0x153f   :  { %3253 = vtanh.f32 %v2306_v60 }
0x1548   :  { %v3252_v5 = vpop.eup %3251 }
0x1549   :  { %v3254_v6 = vpop.eup %3253  ;;  %2202 = vrot.lane.b32.xlu0 %v3252_v5, %s3295_s12 }
0x154a   :  { %2309 = vrot.lane.b32.xlu1 %v3254_v6, %s3295_s12 }
0x15bb   :  { %v2203_v7 = vpop.permute.xlu0 %2202 }
0x15bc   :  { %v2310_v36 = vpop.permute.xlu1 %2309  ;;  %v2205_v55 = vmul.f32 %v3248_v2, %v2203_v7 }
0x15bd   :  { %v2312_v8 = vmul.f32 %v3250_v46, %v2310_v36 }
0x15be   :  { %2207 = vrot.lane.b32.xlu0 %v2205_v55, %s3296_s13 }
0x15bf   :  { %2394 = vrot.lane.b32.xlu1 %v2312_v8, %s3296_s13 }
0x1630   :  { %v2208_v10 = vpop.permute.xlu0 %2207 }
0x1631   :  { %v2395_v11 = vpop.permute.xlu1 %2394  ;;  %2552 = vst.msk [vmem:[%s3819_s7 + $0x30] sm:$0xff] %vm59_vm1, %v2208_v10  ;;  %2962 = vmatmul.mubr.msk.f32.vlgmr.msra.gmra.mrb[28].mxu0 %vm59_vm1, %v2208_v10 }
0x1632   :  { %2973 = vmatmul.mubr.msk.f32.vlgmr.msra.gmra.mrb[24].mxu1 %vm59_vm1, %v2395_v11 }
0x1704   :  { %v2389_v0 = vpop.f32.mrb[28].mxu0 }
0x1705   :  { %v2464_v12 = vpop.f32.mrb[24].mxu1  ;;  %v2963_v13 = vpop.f32.mrb[29].mxu0 }
0x1706   :  { %v2465_v47 = vadd.f32 %v2464_v12, %v2389_v0  ;;  %v2974_v15 = vpop.f32.mrb[25].mxu1 }
0x1708   :  { %v2468_v18 = vadd.f32 %v3264_v17, %v2465_v47 }
0x170a   :  { %3255 = vtanh.f32 %v2468_v18  ;;  %v2557_v19 = vmul.f32 -1.442695, %v2468_v18 }
0x170c   :  { %3257 = vpow2.f32 %v2557_v19 }
0x1714   :  { %v3256_v56 = vpop.eup %3255 }
0x1715   :  { %2478 = vrot.lane.b32.xlu0 %v3256_v56, %s3295_s12 }
0x1716   :  { %v3258_v20 = vpop.eup %3257 }
0x1717   :  { %v2472_v21 = vadd.f32 1.0, %v3258_v20 }
0x1719   :  { %3259 = vrcp.f32 %v2472_v21 }
0x1723   :  { %v3260_v22 = vpop.eup %3259 }
0x1724   :  { %v2476_v25 = vmul.f32 %v3260_v22, %v2199_v58 }
0x1787   :  { %v2479_v23 = vpop.permute.xlu0 %2478 }
0x1788   :  { %v2481_v24 = vmul.f32 %v3260_v22, %v2479_v23 }
0x178a   :  { %2483 = vrot.lane.b32.xlu1 %v2481_v24, %s3296_s13 }
0x17fc   :  { %v2484_v26 = vpop.permute.xlu1 %2483 }
0x17fd   :  { %v2486_v27 = vadd.f32 %v2484_v26, %v2476_v25 }
0x17ff   :  { %3261 = vtanh.f32 %v2486_v27 }
0x1809   :  { %v3262_v28 = vpop.eup %3261 }
0x180a   :  { %2489 = vrot.lane.b32.xlu0 %v3262_v28, %s3295_s12 }
0x187c   :  { %v2490_v29 = vpop.permute.xlu0 %2489 }
0x187d   :  { %v2492_v30 = vmul.f32 %v3260_v22, %v2490_v29 }
0x187f   :  { %2494 = vrot.lane.b32.xlu1 %v2492_v30, %s3296_s13 }
0x18f1   :  { %v2495_v31 = vpop.permute.xlu1 %2494 }
0x18f2   :  { %2558 = vst.msk [vmem:[%s3819_s7 + $0x38] sm:$0xff] %vm59_vm1, %v2495_v31 }
0x18f3   :  { %2503 = vsyncpa [#allocation4], 1 }

</bundles_post_ra>
